<compile_context>
chip_gen: v7x
topology: tpu7x:2x2x1
jax: 0.10.0
libtpu: 0.0.40
codegen_flags: <defaults>
</compile_context>

<pallas_src>
import functools

import jax
import jax.numpy as jnp
from jax.experimental import pallas as pl
from jax.experimental.pallas import tpu as pltpu


def _layer_norm(x, gamma, beta, eps):
    mean = jnp.mean(x, axis=-1, keepdims=True)
    var = jnp.mean(jnp.square(x - mean), axis=-1, keepdims=True)
    return (x - mean) * jax.lax.rsqrt(var + eps) * gamma + beta


def _gelu_tanh(x):
    # TODO(synk): torch.nn.GELU() defaults to the exact erf form; the tanh
    # approximation is used here (no guaranteed erf lowering in Mosaic),
    # max abs deviation ~1e-3. The in-script reference uses the same formula.
    c = 0.7978845608028654  # sqrt(2/pi)
    return 0.5 * x * (1.0 + jnp.tanh(c * (x + 0.044715 * x * x * x)))


def predictor_kernel(x_ref, w_qkv_ref, wo_t_ref, ln1_g_ref, ln1_b_ref,
                     w1_t_ref, b1_ref, w2_t_ref, b2_ref,
                     ln2_g_ref, ln2_b_ref, w_out_t_ref, b_out_ref,
                     pool_mat_ref,
                     o_ref,
                     *, num_heads, d_k, d_model, seq_len, bblk, eps,
                     matmul_dtype, approx_softmax):
    D = d_model
    S = seq_len
    N = bblk * S

    x = x_ref[...].reshape(N, D)                                      # (Bblk*S, D)

    def mm(a, b_val):
        # MXU matmul with f32 accumulation; operands optionally bf16.
        return jnp.dot(a.astype(matmul_dtype), b_val,
                       preferred_element_type=jnp.float32)

    # Fused QKV projection: one (N, D) @ (D, 3D) MXU matmul. Weights were
    # pre-transposed on the host and 1/sqrt(d_k) folded into the Q weight.
    qkv = mm(x, w_qkv_ref[...])                                       # (N, 3D) f32

    # Per-head scaled dot-product attention, batched over the batch block.
    # Head results stay in vregs and are concatenated once (no VMEM scratch
    # store->load round trip).
    # TODO(synk): mask is None and dropout is eval-mode identity, so neither
    # is applied.
    heads = []
    for h in range(num_heads):
        lo, hi = h * d_k, (h + 1) * d_k
        qh = qkv[:, 0 * D + lo:0 * D + hi].reshape(bblk, S, d_k).astype(matmul_dtype)
        kh = qkv[:, 1 * D + lo:1 * D + hi].reshape(bblk, S, d_k).astype(matmul_dtype)
        vh = qkv[:, 2 * D + lo:2 * D + hi].reshape(bblk, S, d_k).astype(matmul_dtype)

        s = jnp.einsum('bqd,bkd->bqk', qh, kh,
                       preferred_element_type=jnp.float32)            # (Bblk, S, S)
        s = s - jnp.max(s, axis=-1, keepdims=True)
        p = jnp.exp(s)
        denom = jnp.sum(p, axis=-1, keepdims=True)
        if approx_softmax:
            p = p * pl.reciprocal(denom, approx=True)                  # EUP slot
        else:
            p = p / denom                                              # exact softmax
        ctx_h = jnp.einsum('bqk,bkd->bqd', p.astype(matmul_dtype), vh,
                           preferred_element_type=jnp.float32)         # (Bblk, S, d_k)
        heads.append(ctx_h.reshape(N, d_k))

    ctx = jnp.concatenate(heads, axis=-1)                              # (N, D) in vregs

    # MHA epilogue: output projection + residual (over the attention output,
    # exactly as in the PyTorch module: layer_norm(output_linear(x) + x)) + LN.
    y = mm(ctx, wo_t_ref[...]) + ctx
    y = _layer_norm(y, ln1_g_ref[...], ln1_b_ref[...], eps)

    # Position-wise feed-forward + residual + LayerNorm (all elementwise f32).
    h1 = mm(y, w1_t_ref[...]) + b1_ref[...]
    h1 = _gelu_tanh(h1)
    h2 = mm(h1, w2_t_ref[...]) + b2_ref[...]
    z = _layer_norm(h2 + y, ln2_g_ref[...], ln2_b_ref[...], eps)       # (N, D)

    # Mean over the sequence dim via a host-precomputed block-diagonal
    # averaging matrix (MXU reduction; avoids a 3-D middle-axis vector reduce
    # and any in-kernel iota/compare/select setup).
    pooled = jnp.dot(pool_mat_ref[...], z,
                     preferred_element_type=jnp.float32)               # (Bblk, D)

    # Classifier head (tiny; stays f32).
    logits = jnp.dot(pooled, w_out_t_ref[...],
                     preferred_element_type=jnp.float32) + b_out_ref[...]
    o_ref[...] = logits.astype(o_ref.dtype)


def _device_kind():
    try:
        return jax.devices()[0].device_kind.lower()
    except Exception:
        return ""


def chronic_disease_predictor(x, params, *, num_heads, block_batch=None,
                              matmul_dtype=jnp.float32, approx_softmax=False):
    (wq, wk, wv, wo, ln1_g, ln1_b, w1, b1, w2, b2,
     ln2_g, ln2_b, w_out, b_out) = params
    B, S, D = x.shape
    assert D % num_heads == 0
    d_k = D // num_heads
    F = w1.shape[0]
    C = w_out.shape[0]

    kind = _device_kind()
    if block_batch is None:
        # v5e/v6e: whole batch in one grid step (amortise ~0.35us/step overhead).
        # v7x: split across the two TensorCores when the half-batch keeps the
        # output block sublane-aligned (multiple of 8).
        block_batch = B
        if "v7" in kind and B % 2 == 0 and (B // 2) % 8 == 0:
            block_batch = B // 2
    assert B % block_batch == 0
    grid = (B // block_batch,)

    # v7x has 64 MiB VMEM/TC; v5e/v6e have 128 MiB -> raise the scoped limit.
    vmem_limit = (48 if "v7" in kind else 64) * 1024 * 1024

    # Host-side weight prep: fuse + pre-transpose, fold the 1/sqrt(d_k) scale,
    # and (optionally) cast matmul operands to bf16. Elementwise params stay f32.
    scale = 1.0 / jnp.sqrt(jnp.float32(d_k))
    w_qkv = jnp.concatenate([wq.T * scale, wk.T, wv.T], axis=1).astype(matmul_dtype)
    wo_t = wo.T.astype(matmul_dtype)                                   # (D, D)
    w1_t = w1.T.astype(matmul_dtype)                                   # (D, F)
    w2_t = w2.T.astype(matmul_dtype)                                   # (F, D)
    w_out_t = w_out.T.astype(jnp.float32)                              # (D, C)

    # Block-diagonal sequence-averaging matrix (Bblk, Bblk*S), built once on host.
    pool_mat = (jnp.repeat(jnp.eye(block_batch, dtype=jnp.float32), S, axis=1)
                / jnp.float32(S))

    kernel = functools.partial(
        predictor_kernel, num_heads=num_heads, d_k=d_k, d_model=D,
        seq_len=S, bblk=block_batch, eps=1e-5,
        matmul_dtype=matmul_dtype, approx_softmax=approx_softmax)

    def const_spec(shape):
        return pl.BlockSpec(shape, lambda i, _s=shape: tuple(0 for _ in _s))

    grid_spec = pltpu.PrefetchScalarGridSpec(
        num_scalar_prefetch=0,
        grid=grid,
        in_specs=[
            pl.BlockSpec((block_batch, S, D), lambda i: (i, 0, 0)),    # x
            const_spec((D, 3 * D)),                                    # w_qkv
            const_spec((D, D)),                                        # wo_t
            const_spec((1, D)), const_spec((1, D)),                    # ln1 gamma/beta
            const_spec((D, F)), const_spec((1, F)),                    # w1_t, b1
            const_spec((F, D)), const_spec((1, D)),                    # w2_t, b2
            const_spec((1, D)), const_spec((1, D)),                    # ln2 gamma/beta
            const_spec((D, C)), const_spec((1, C)),                    # w_out_t, b_out
            const_spec((block_batch, block_batch * S)),                # pool_mat
        ],
        out_specs=pl.BlockSpec((block_batch, C), lambda i: (i, 0)),
    )

    return pl.pallas_call(
        kernel,
        out_shape=jax.ShapeDtypeStruct((B, C), x.dtype),
        grid_spec=grid_spec,
        compiler_params=pltpu.CompilerParams(
            dimension_semantics=("parallel",),
            vmem_limit_bytes=vmem_limit,
        ),
    )(x, w_qkv, wo_t,
      ln1_g.reshape(1, D), ln1_b.reshape(1, D),
      w1_t, b1.reshape(1, F),
      w2_t, b2.reshape(1, D),
      ln2_g.reshape(1, D), ln2_b.reshape(1, D),
      w_out_t, b_out.reshape(1, C),
      pool_mat)


def reference_predictor(x, params, *, num_heads):
    """Plain-JAX reference matching the PyTorch forward (eval mode, mask=None)."""
    (wq, wk, wv, wo, ln1_g, ln1_b, w1, b1, w2, b2,
     ln2_g, ln2_b, w_out, b_out) = params
    B, S, D = x.shape
    d_k = D // num_heads

    def proj(w):
        return (x @ w.T).reshape(B, S, num_heads, d_k).transpose(0, 2, 1, 3)

    Q, K, V = proj(wq), proj(wk), proj(wv)
    scores = jnp.einsum('bhqd,bhkd->bhqk', Q, K) / jnp.sqrt(jnp.float32(d_k))
    p = jax.nn.softmax(scores, axis=-1)
    ctx = jnp.einsum('bhqk,bhkd->bhqd', p, V).transpose(0, 2, 1, 3).reshape(B, S, D)

    y = _layer_norm(ctx @ wo.T + ctx, ln1_g, ln1_b, 1e-5)
    h = _gelu_tanh(y @ w1.T + b1)
    z = _layer_norm(h @ w2.T + b2 + y, ln2_g, ln2_b, 1e-5)
    pooled = jnp.mean(z, axis=1)
    return pooled @ w_out.T + b_out


if __name__ == "__main__":
    B, S, D, H = 2, 8, 32, 4       # batch, seq, d_model, num_heads
    F, C = 64, 8                   # d_ff, num_diseases

    key = jax.random.PRNGKey(0)
    keys = jax.random.split(key, 12)

    x = jax.random.normal(keys[0], (B, S, D), dtype=jnp.float32)

    def linear_init(k, out_f, in_f):
        bound = 1.0 / jnp.sqrt(jnp.float32(in_f))
        return jax.random.uniform(k, (out_f, in_f), jnp.float32, -bound, bound)

    wq = linear_init(keys[1], D, D)
    wk = linear_init(keys[2], D, D)
    wv = linear_init(keys[3], D, D)
    wo = linear_init(keys[4], D, D)
    ln1_g = 1.0 + 0.1 * jax.random.normal(keys[5], (D,), jnp.float32)
    ln1_b = 0.1 * jax.random.normal(keys[6], (D,), jnp.float32)
    w1 = linear_init(keys[7], F, D)
    b1 = 0.1 * jax.random.normal(keys[8], (F,), jnp.float32)
    w2 = linear_init(keys[9], D, F)
    b2 = 0.1 * jax.random.normal(keys[10], (D,), jnp.float32)
    ln2_g = jnp.ones((D,), jnp.float32)
    ln2_b = jnp.zeros((D,), jnp.float32)
    w_out = linear_init(keys[11], C, D)
    b_out = jnp.zeros((C,), jnp.float32)

    params = (wq, wk, wv, wo, ln1_g, ln1_b, w1, b1, w2, b2,
              ln2_g, ln2_b, w_out, b_out)

    ref = reference_predictor(x, params, num_heads=H)

    # Exact path (f32 matmul operands, exact softmax divide) — strict check.
    out = chronic_disease_predictor(x, params, num_heads=H)
    out = jax.block_until_ready(out)
    assert out.shape == (B, C)
    assert jnp.allclose(out, ref, atol=1e-4, rtol=1e-4), \
        "Pallas output mismatch vs reference (exact path)"

    # Fast path (bf16 matmul operands on the MXU, f32 accumulation + f32
    # elementwise math, approx-reciprocal softmax on the EUP) — loose check.
    out_fast = chronic_disease_predictor(
        x, params, num_heads=H,
        matmul_dtype=jnp.bfloat16, approx_softmax=True)
    out_fast = jax.block_until_ready(out_fast)
    assert out_fast.shape == (B, C)
    assert jnp.allclose(out_fast, ref, atol=5e-2, rtol=5e-2), \
        "Pallas output mismatch vs reference (bf16 fast path)"

    print("KERNEL_OK")
</pallas_src>

<mosaic_0001>
module attributes {stable_mosaic.version = 11 : i64} {
  func.func @predictor_kernel(%arg0: i32, %arg1: memref<2x8x32xf32, #tpu.memory_space<vmem>>, %arg2: memref<32x96xf32, #tpu.memory_space<vmem>>, %arg3: memref<32x32xf32, #tpu.memory_space<vmem>>, %arg4: memref<1x32xf32, #tpu.memory_space<vmem>>, %arg5: memref<1x32xf32, #tpu.memory_space<vmem>>, %arg6: memref<32x64xf32, #tpu.memory_space<vmem>>, %arg7: memref<1x64xf32, #tpu.memory_space<vmem>>, %arg8: memref<64x32xf32, #tpu.memory_space<vmem>>, %arg9: memref<1x32xf32, #tpu.memory_space<vmem>>, %arg10: memref<1x32xf32, #tpu.memory_space<vmem>>, %arg11: memref<1x32xf32, #tpu.memory_space<vmem>>, %arg12: memref<32x8xf32, #tpu.memory_space<vmem>>, %arg13: memref<1x8xf32, #tpu.memory_space<vmem>>, %arg14: memref<2x16xf32, #tpu.memory_space<vmem>>, %arg15: memref<2x8xf32, #tpu.memory_space<vmem>>) attributes {dimension_semantics = [#tpu.dimension_semantics<parallel>], iteration_bounds = array<i64: 1>, scalar_prefetch = 0 : i64, scratch_operands = 0 : i64, tpu.core_type = #tpu.core_type<tc>, window_params = [{transform_indices = @transform_0, window_bounds = array<i64: 2, 8, 32>}, {pipeline_mode = #tpu.pipeline_mode<synchronous>, transform_indices = @transform_1, window_bounds = array<i64: 32, 96>}, {pipeline_mode = #tpu.pipeline_mode<synchronous>, transform_indices = @transform_2, window_bounds = array<i64: 32, 32>}, {pipeline_mode = #tpu.pipeline_mode<synchronous>, transform_indices = @transform_3, window_bounds = array<i64: 1, 32>}, {pipeline_mode = #tpu.pipeline_mode<synchronous>, transform_indices = @transform_4, window_bounds = array<i64: 1, 32>}, {pipeline_mode = #tpu.pipeline_mode<synchronous>, transform_indices = @transform_5, window_bounds = array<i64: 32, 64>}, {pipeline_mode = #tpu.pipeline_mode<synchronous>, transform_indices = @transform_6, window_bounds = array<i64: 1, 64>}, {pipeline_mode = #tpu.pipeline_mode<synchronous>, transform_indices = @transform_7, window_bounds = array<i64: 64, 32>}, {pipeline_mode = #tpu.pipeline_mode<synchronous>, transform_indices = @transform_8, window_bounds = array<i64: 1, 32>}, {pipeline_mode = #tpu.pipeline_mode<synchronous>, transform_indices = @transform_9, window_bounds = array<i64: 1, 32>}, {pipeline_mode = #tpu.pipeline_mode<synchronous>, transform_indices = @transform_10, window_bounds = array<i64: 1, 32>}, {pipeline_mode = #tpu.pipeline_mode<synchronous>, transform_indices = @transform_11, window_bounds = array<i64: 32, 8>}, {pipeline_mode = #tpu.pipeline_mode<synchronous>, transform_indices = @transform_12, window_bounds = array<i64: 1, 8>}, {pipeline_mode = #tpu.pipeline_mode<synchronous>, transform_indices = @transform_13, window_bounds = array<i64: 2, 16>}, {transform_indices = @transform_14, window_bounds = array<i64: 2, 8>}]} {
    %c0 = arith.constant 0 : index
    %c0_0 = arith.constant 0 : index
    %c0_1 = arith.constant 0 : index
    %0 = vector.load %arg1[%c0, %c0_0, %c0_1] : memref<2x8x32xf32, #tpu.memory_space<vmem>>, vector<2x8x32xf32>
    %1 = vector.shape_cast %0 : vector<2x8x32xf32> to vector<16x32xf32>
    %c0_2 = arith.constant 0 : index
    %c0_3 = arith.constant 0 : index
    %2 = vector.load %arg2[%c0_2, %c0_3] : memref<32x96xf32, #tpu.memory_space<vmem>>, vector<32x96xf32>
    %cst = arith.constant dense<0.000000e+00> : vector<16x96xf32>
    %3 = tpu.matmul %1, %2, %cst {dimension_numbers = #tpu.dot_dimension_numbers<[1], [0], [0], [1], [0, 0, 1, 1], [], []>} : vector<16x32xf32>, vector<32x96xf32>, vector<16x96xf32> -> vector<16x96xf32>
    %4 = vector.extract_strided_slice %3 {offsets = [0, 0], sizes = [16, 8], strides = [1, 1]} : vector<16x96xf32> to vector<16x8xf32>
    %5 = vector.shape_cast %4 : vector<16x8xf32> to vector<2x8x8xf32>
    %6 = vector.extract_strided_slice %3 {offsets = [0, 32], sizes = [16, 8], strides = [1, 1]} : vector<16x96xf32> to vector<16x8xf32>
    %7 = vector.shape_cast %6 : vector<16x8xf32> to vector<2x8x8xf32>
    %8 = vector.extract_strided_slice %3 {offsets = [0, 64], sizes = [16, 8], strides = [1, 1]} : vector<16x96xf32> to vector<16x8xf32>
    %9 = vector.shape_cast %8 : vector<16x8xf32> to vector<2x8x8xf32>
    "tpu.trace_start"() <{level = 10 : i32, message = "bqd,bkd->bqk"}> : () -> ()
    %cst_4 = arith.constant dense<0.000000e+00> : vector<2x8x8xf32>
    %10 = tpu.matmul %5, %7, %cst_4 {dimension_numbers = #tpu.dot_dimension_numbers<[2], [2], [1], [1], [0, 0, 0, 1, 1, 1], [0], [0]>} : vector<2x8x8xf32>, vector<2x8x8xf32>, vector<2x8x8xf32> -> vector<2x8x8xf32>
    "tpu.trace_stop"() : () -> ()
    %cst_5 = arith.constant dense<0xFF800000> : vector<2x8xf32>
    %11 = vector.multi_reduction <maximumf>, %10, %cst_5 [2] : vector<2x8x8xf32> to vector<2x8xf32>
    %12 = vector.shape_cast %11 : vector<2x8xf32> to vector<2x8x1xf32>
    %13 = vector.broadcast %12 : vector<2x8x1xf32> to vector<2x8x8xf32>
    %14 = arith.subf %10, %13 : vector<2x8x8xf32>
    %15 = math.exp %14 : vector<2x8x8xf32>
    %cst_6 = arith.constant dense<0.000000e+00> : vector<2x8xf32>
    %16 = vector.multi_reduction <add>, %15, %cst_6 [2] : vector<2x8x8xf32> to vector<2x8xf32>
    %17 = vector.shape_cast %16 : vector<2x8xf32> to vector<2x8x1xf32>
    %18 = vector.broadcast %17 : vector<2x8x1xf32> to vector<2x8x8xf32>
    %19 = arith.divf %15, %18 : vector<2x8x8xf32>
    "tpu.trace_start"() <{level = 10 : i32, message = "bqk,bkd->bqd"}> : () -> ()
    %cst_7 = arith.constant dense<0.000000e+00> : vector<2x8x8xf32>
    %20 = tpu.matmul %19, %9, %cst_7 {dimension_numbers = #tpu.dot_dimension_numbers<[2], [1], [1], [2], [0, 0, 0, 1, 1, 2], [0], [0]>} : vector<2x8x8xf32>, vector<2x8x8xf32>, vector<2x8x8xf32> -> vector<2x8x8xf32>
    "tpu.trace_stop"() : () -> ()
    %21 = vector.shape_cast %20 : vector<2x8x8xf32> to vector<16x8xf32>
    %22 = vector.extract_strided_slice %3 {offsets = [0, 8], sizes = [16, 8], strides = [1, 1]} : vector<16x96xf32> to vector<16x8xf32>
    %23 = vector.shape_cast %22 : vector<16x8xf32> to vector<2x8x8xf32>
    %24 = vector.extract_strided_slice %3 {offsets = [0, 40], sizes = [16, 8], strides = [1, 1]} : vector<16x96xf32> to vector<16x8xf32>
    %25 = vector.shape_cast %24 : vector<16x8xf32> to vector<2x8x8xf32>
    %26 = vector.extract_strided_slice %3 {offsets = [0, 72], sizes = [16, 8], strides = [1, 1]} : vector<16x96xf32> to vector<16x8xf32>
    %27 = vector.shape_cast %26 : vector<16x8xf32> to vector<2x8x8xf32>
    "tpu.trace_start"() <{level = 10 : i32, message = "bqd,bkd->bqk"}> : () -> ()
    %cst_8 = arith.constant dense<0.000000e+00> : vector<2x8x8xf32>
    %28 = tpu.matmul %23, %25, %cst_8 {dimension_numbers = #tpu.dot_dimension_numbers<[2], [2], [1], [1], [0, 0, 0, 1, 1, 1], [0], [0]>} : vector<2x8x8xf32>, vector<2x8x8xf32>, vector<2x8x8xf32> -> vector<2x8x8xf32>
    "tpu.trace_stop"() : () -> ()
    %cst_9 = arith.constant dense<0xFF800000> : vector<2x8xf32>
    %29 = vector.multi_reduction <maximumf>, %28, %cst_9 [2] : vector<2x8x8xf32> to vector<2x8xf32>
    %30 = vector.shape_cast %29 : vector<2x8xf32> to vector<2x8x1xf32>
    %31 = vector.broadcast %30 : vector<2x8x1xf32> to vector<2x8x8xf32>
    %32 = arith.subf %28, %31 : vector<2x8x8xf32>
    %33 = math.exp %32 : vector<2x8x8xf32>
    %cst_10 = arith.constant dense<0.000000e+00> : vector<2x8xf32>
    %34 = vector.multi_reduction <add>, %33, %cst_10 [2] : vector<2x8x8xf32> to vector<2x8xf32>
    %35 = vector.shape_cast %34 : vector<2x8xf32> to vector<2x8x1xf32>
    %36 = vector.broadcast %35 : vector<2x8x1xf32> to vector<2x8x8xf32>
    %37 = arith.divf %33, %36 : vector<2x8x8xf32>
    "tpu.trace_start"() <{level = 10 : i32, message = "bqk,bkd->bqd"}> : () -> ()
    %cst_11 = arith.constant dense<0.000000e+00> : vector<2x8x8xf32>
    %38 = tpu.matmul %37, %27, %cst_11 {dimension_numbers = #tpu.dot_dimension_numbers<[2], [1], [1], [2], [0, 0, 0, 1, 1, 2], [0], [0]>} : vector<2x8x8xf32>, vector<2x8x8xf32>, vector<2x8x8xf32> -> vector<2x8x8xf32>
    "tpu.trace_stop"() : () -> ()
    %39 = vector.shape_cast %38 : vector<2x8x8xf32> to vector<16x8xf32>
    %40 = vector.extract_strided_slice %3 {offsets = [0, 16], sizes = [16, 8], strides = [1, 1]} : vector<16x96xf32> to vector<16x8xf32>
    %41 = vector.shape_cast %40 : vector<16x8xf32> to vector<2x8x8xf32>
    %42 = vector.extract_strided_slice %3 {offsets = [0, 48], sizes = [16, 8], strides = [1, 1]} : vector<16x96xf32> to vector<16x8xf32>
    %43 = vector.shape_cast %42 : vector<16x8xf32> to vector<2x8x8xf32>
    %44 = vector.extract_strided_slice %3 {offsets = [0, 80], sizes = [16, 8], strides = [1, 1]} : vector<16x96xf32> to vector<16x8xf32>
    %45 = vector.shape_cast %44 : vector<16x8xf32> to vector<2x8x8xf32>
    "tpu.trace_start"() <{level = 10 : i32, message = "bqd,bkd->bqk"}> : () -> ()
    %cst_12 = arith.constant dense<0.000000e+00> : vector<2x8x8xf32>
    %46 = tpu.matmul %41, %43, %cst_12 {dimension_numbers = #tpu.dot_dimension_numbers<[2], [2], [1], [1], [0, 0, 0, 1, 1, 1], [0], [0]>} : vector<2x8x8xf32>, vector<2x8x8xf32>, vector<2x8x8xf32> -> vector<2x8x8xf32>
    "tpu.trace_stop"() : () -> ()
    %cst_13 = arith.constant dense<0xFF800000> : vector<2x8xf32>
    %47 = vector.multi_reduction <maximumf>, %46, %cst_13 [2] : vector<2x8x8xf32> to vector<2x8xf32>
    %48 = vector.shape_cast %47 : vector<2x8xf32> to vector<2x8x1xf32>
    %49 = vector.broadcast %48 : vector<2x8x1xf32> to vector<2x8x8xf32>
    %50 = arith.subf %46, %49 : vector<2x8x8xf32>
    %51 = math.exp %50 : vector<2x8x8xf32>
    %cst_14 = arith.constant dense<0.000000e+00> : vector<2x8xf32>
    %52 = vector.multi_reduction <add>, %51, %cst_14 [2] : vector<2x8x8xf32> to vector<2x8xf32>
    %53 = vector.shape_cast %52 : vector<2x8xf32> to vector<2x8x1xf32>
    %54 = vector.broadcast %53 : vector<2x8x1xf32> to vector<2x8x8xf32>
    %55 = arith.divf %51, %54 : vector<2x8x8xf32>
    "tpu.trace_start"() <{level = 10 : i32, message = "bqk,bkd->bqd"}> : () -> ()
    %cst_15 = arith.constant dense<0.000000e+00> : vector<2x8x8xf32>
    %56 = tpu.matmul %55, %45, %cst_15 {dimension_numbers = #tpu.dot_dimension_numbers<[2], [1], [1], [2], [0, 0, 0, 1, 1, 2], [0], [0]>} : vector<2x8x8xf32>, vector<2x8x8xf32>, vector<2x8x8xf32> -> vector<2x8x8xf32>
    "tpu.trace_stop"() : () -> ()
    %57 = vector.shape_cast %56 : vector<2x8x8xf32> to vector<16x8xf32>
    %58 = vector.extract_strided_slice %3 {offsets = [0, 24], sizes = [16, 8], strides = [1, 1]} : vector<16x96xf32> to vector<16x8xf32>
    %59 = vector.shape_cast %58 : vector<16x8xf32> to vector<2x8x8xf32>
    %60 = vector.extract_strided_slice %3 {offsets = [0, 56], sizes = [16, 8], strides = [1, 1]} : vector<16x96xf32> to vector<16x8xf32>
    %61 = vector.shape_cast %60 : vector<16x8xf32> to vector<2x8x8xf32>
    %62 = vector.extract_strided_slice %3 {offsets = [0, 88], sizes = [16, 8], strides = [1, 1]} : vector<16x96xf32> to vector<16x8xf32>
    %63 = vector.shape_cast %62 : vector<16x8xf32> to vector<2x8x8xf32>
    "tpu.trace_start"() <{level = 10 : i32, message = "bqd,bkd->bqk"}> : () -> ()
    %cst_16 = arith.constant dense<0.000000e+00> : vector<2x8x8xf32>
    %64 = tpu.matmul %59, %61, %cst_16 {dimension_numbers = #tpu.dot_dimension_numbers<[2], [2], [1], [1], [0, 0, 0, 1, 1, 1], [0], [0]>} : vector<2x8x8xf32>, vector<2x8x8xf32>, vector<2x8x8xf32> -> vector<2x8x8xf32>
    "tpu.trace_stop"() : () -> ()
    %cst_17 = arith.constant dense<0xFF800000> : vector<2x8xf32>
    %65 = vector.multi_reduction <maximumf>, %64, %cst_17 [2] : vector<2x8x8xf32> to vector<2x8xf32>
    %66 = vector.shape_cast %65 : vector<2x8xf32> to vector<2x8x1xf32>
    %67 = vector.broadcast %66 : vector<2x8x1xf32> to vector<2x8x8xf32>
    %68 = arith.subf %64, %67 : vector<2x8x8xf32>
    %69 = math.exp %68 : vector<2x8x8xf32>
    %cst_18 = arith.constant dense<0.000000e+00> : vector<2x8xf32>
    %70 = vector.multi_reduction <add>, %69, %cst_18 [2] : vector<2x8x8xf32> to vector<2x8xf32>
    %71 = vector.shape_cast %70 : vector<2x8xf32> to vector<2x8x1xf32>
    %72 = vector.broadcast %71 : vector<2x8x1xf32> to vector<2x8x8xf32>
    %73 = arith.divf %69, %72 : vector<2x8x8xf32>
    "tpu.trace_start"() <{level = 10 : i32, message = "bqk,bkd->bqd"}> : () -> ()
    %cst_19 = arith.constant dense<0.000000e+00> : vector<2x8x8xf32>
    %74 = tpu.matmul %73, %63, %cst_19 {dimension_numbers = #tpu.dot_dimension_numbers<[2], [1], [1], [2], [0, 0, 0, 1, 1, 2], [0], [0]>} : vector<2x8x8xf32>, vector<2x8x8xf32>, vector<2x8x8xf32> -> vector<2x8x8xf32>
    "tpu.trace_stop"() : () -> ()
    %75 = vector.shape_cast %74 : vector<2x8x8xf32> to vector<16x8xf32>
    %76 = tpu.concatenate %21, %39, %57, %75 in 1 : vector<16x8xf32>, vector<16x8xf32>, vector<16x8xf32>, vector<16x8xf32> -> vector<16x32xf32>
    %c0_20 = arith.constant 0 : index
    %c0_21 = arith.constant 0 : index
    %77 = vector.load %arg3[%c0_20, %c0_21] : memref<32x32xf32, #tpu.memory_space<vmem>>, vector<32x32xf32>
    %cst_22 = arith.constant dense<0.000000e+00> : vector<16x32xf32>
    %78 = tpu.matmul %76, %77, %cst_22 {dimension_numbers = #tpu.dot_dimension_numbers<[1], [0], [0], [1], [0, 0, 1, 1], [], []>} : vector<16x32xf32>, vector<32x32xf32>, vector<16x32xf32> -> vector<16x32xf32>
    %79 = arith.addf %78, %76 : vector<16x32xf32>
    %c0_23 = arith.constant 0 : index
    %c0_24 = arith.constant 0 : index
    %80 = vector.load %arg4[%c0_23, %c0_24] : memref<1x32xf32, #tpu.memory_space<vmem>>, vector<1x32xf32>
    %c0_25 = arith.constant 0 : index
    %c0_26 = arith.constant 0 : index
    %81 = vector.load %arg5[%c0_25, %c0_26] : memref<1x32xf32, #tpu.memory_space<vmem>>, vector<1x32xf32>
    %cst_27 = arith.constant dense<0.000000e+00> : vector<16xf32>
    %82 = vector.multi_reduction <add>, %79, %cst_27 [1] : vector<16x32xf32> to vector<16xf32>
    %83 = vector.shape_cast %82 : vector<16xf32> to vector<16x1xf32>
    %cst_28 = arith.constant 3.200000e+01 : f32
    %84 = vector.broadcast %cst_28 : f32 to vector<16x1xf32>
    %85 = arith.divf %83, %84 : vector<16x1xf32>
    %86 = vector.broadcast %85 : vector<16x1xf32> to vector<16x32xf32>
    %87 = arith.subf %79, %86 : vector<16x32xf32>
    %88 = arith.mulf %87, %87 : vector<16x32xf32>
    %cst_29 = arith.constant dense<0.000000e+00> : vector<16xf32>
    %89 = vector.multi_reduction <add>, %88, %cst_29 [1] : vector<16x32xf32> to vector<16xf32>
    %90 = vector.shape_cast %89 : vector<16xf32> to vector<16x1xf32>
    %cst_30 = arith.constant 3.200000e+01 : f32
    %91 = vector.broadcast %cst_30 : f32 to vector<16x1xf32>
    %92 = arith.divf %90, %91 : vector<16x1xf32>
    %93 = vector.broadcast %85 : vector<16x1xf32> to vector<16x32xf32>
    %94 = arith.subf %79, %93 : vector<16x32xf32>
    %cst_31 = arith.constant 9.99999974E-6 : f32
    %95 = vector.broadcast %cst_31 : f32 to vector<16x1xf32>
    %96 = arith.addf %92, %95 : vector<16x1xf32>
    %97 = math.rsqrt %96 : vector<16x1xf32>
    %98 = vector.broadcast %97 : vector<16x1xf32> to vector<16x32xf32>
    %99 = arith.mulf %94, %98 : vector<16x32xf32>
    %100 = vector.broadcast %80 : vector<1x32xf32> to vector<16x32xf32>
    %101 = arith.mulf %99, %100 : vector<16x32xf32>
    %102 = vector.broadcast %81 : vector<1x32xf32> to vector<16x32xf32>
    %103 = arith.addf %101, %102 : vector<16x32xf32>
    %c0_32 = arith.constant 0 : index
    %c0_33 = arith.constant 0 : index
    %104 = vector.load %arg6[%c0_32, %c0_33] : memref<32x64xf32, #tpu.memory_space<vmem>>, vector<32x64xf32>
    %cst_34 = arith.constant dense<0.000000e+00> : vector<16x64xf32>
    %105 = tpu.matmul %103, %104, %cst_34 {dimension_numbers = #tpu.dot_dimension_numbers<[1], [0], [0], [1], [0, 0, 1, 1], [], []>} : vector<16x32xf32>, vector<32x64xf32>, vector<16x64xf32> -> vector<16x64xf32>
    %c0_35 = arith.constant 0 : index
    %c0_36 = arith.constant 0 : index
    %106 = vector.load %arg7[%c0_35, %c0_36] : memref<1x64xf32, #tpu.memory_space<vmem>>, vector<1x64xf32>
    %107 = vector.broadcast %106 : vector<1x64xf32> to vector<16x64xf32>
    %108 = arith.addf %105, %107 : vector<16x64xf32>
    %cst_37 = arith.constant 5.000000e-01 : f32
    %109 = vector.broadcast %cst_37 : f32 to vector<16x64xf32>
    %110 = arith.mulf %109, %108 : vector<16x64xf32>
    %cst_38 = arith.constant 4.471500e-02 : f32
    %111 = vector.broadcast %cst_38 : f32 to vector<16x64xf32>
    %112 = arith.mulf %111, %108 : vector<16x64xf32>
    %113 = arith.mulf %112, %108 : vector<16x64xf32>
    %114 = arith.mulf %113, %108 : vector<16x64xf32>
    %115 = arith.addf %108, %114 : vector<16x64xf32>
    %cst_39 = arith.constant 0.797884583 : f32
    %116 = vector.broadcast %cst_39 : f32 to vector<16x64xf32>
    %117 = arith.mulf %116, %115 : vector<16x64xf32>
    %118 = math.tanh %117 : vector<16x64xf32>
    %cst_40 = arith.constant 1.000000e+00 : f32
    %119 = vector.broadcast %cst_40 : f32 to vector<16x64xf32>
    %120 = arith.addf %119, %118 : vector<16x64xf32>
    %121 = arith.mulf %110, %120 : vector<16x64xf32>
    %c0_41 = arith.constant 0 : index
    %c0_42 = arith.constant 0 : index
    %122 = vector.load %arg8[%c0_41, %c0_42] : memref<64x32xf32, #tpu.memory_space<vmem>>, vector<64x32xf32>
    %cst_43 = arith.constant dense<0.000000e+00> : vector<16x32xf32>
    %123 = tpu.matmul %121, %122, %cst_43 {dimension_numbers = #tpu.dot_dimension_numbers<[1], [0], [0], [1], [0, 0, 1, 1], [], []>} : vector<16x64xf32>, vector<64x32xf32>, vector<16x32xf32> -> vector<16x32xf32>
    %c0_44 = arith.constant 0 : index
    %c0_45 = arith.constant 0 : index
    %124 = vector.load %arg9[%c0_44, %c0_45] : memref<1x32xf32, #tpu.memory_space<vmem>>, vector<1x32xf32>
    %125 = vector.broadcast %124 : vector<1x32xf32> to vector<16x32xf32>
    %126 = arith.addf %123, %125 : vector<16x32xf32>
    %127 = arith.addf %126, %103 : vector<16x32xf32>
    %c0_46 = arith.constant 0 : index
    %c0_47 = arith.constant 0 : index
    %128 = vector.load %arg10[%c0_46, %c0_47] : memref<1x32xf32, #tpu.memory_space<vmem>>, vector<1x32xf32>
    %c0_48 = arith.constant 0 : index
    %c0_49 = arith.constant 0 : index
    %129 = vector.load %arg11[%c0_48, %c0_49] : memref<1x32xf32, #tpu.memory_space<vmem>>, vector<1x32xf32>
    %cst_50 = arith.constant dense<0.000000e+00> : vector<16xf32>
    %130 = vector.multi_reduction <add>, %127, %cst_50 [1] : vector<16x32xf32> to vector<16xf32>
    %131 = vector.shape_cast %130 : vector<16xf32> to vector<16x1xf32>
    %cst_51 = arith.constant 3.200000e+01 : f32
    %132 = vector.broadcast %cst_51 : f32 to vector<16x1xf32>
    %133 = arith.divf %131, %132 : vector<16x1xf32>
    %134 = vector.broadcast %133 : vector<16x1xf32> to vector<16x32xf32>
    %135 = arith.subf %127, %134 : vector<16x32xf32>
    %136 = arith.mulf %135, %135 : vector<16x32xf32>
    %cst_52 = arith.constant dense<0.000000e+00> : vector<16xf32>
    %137 = vector.multi_reduction <add>, %136, %cst_52 [1] : vector<16x32xf32> to vector<16xf32>
    %138 = vector.shape_cast %137 : vector<16xf32> to vector<16x1xf32>
    %cst_53 = arith.constant 3.200000e+01 : f32
    %139 = vector.broadcast %cst_53 : f32 to vector<16x1xf32>
    %140 = arith.divf %138, %139 : vector<16x1xf32>
    %141 = vector.broadcast %133 : vector<16x1xf32> to vector<16x32xf32>
    %142 = arith.subf %127, %141 : vector<16x32xf32>
    %cst_54 = arith.constant 9.99999974E-6 : f32
    %143 = vector.broadcast %cst_54 : f32 to vector<16x1xf32>
    %144 = arith.addf %140, %143 : vector<16x1xf32>
    %145 = math.rsqrt %144 : vector<16x1xf32>
    %146 = vector.broadcast %145 : vector<16x1xf32> to vector<16x32xf32>
    %147 = arith.mulf %142, %146 : vector<16x32xf32>
    %148 = vector.broadcast %128 : vector<1x32xf32> to vector<16x32xf32>
    %149 = arith.mulf %147, %148 : vector<16x32xf32>
    %150 = vector.broadcast %129 : vector<1x32xf32> to vector<16x32xf32>
    %151 = arith.addf %149, %150 : vector<16x32xf32>
    %c0_55 = arith.constant 0 : index
    %c0_56 = arith.constant 0 : index
    %152 = vector.load %arg14[%c0_55, %c0_56] : memref<2x16xf32, #tpu.memory_space<vmem>>, vector<2x16xf32>
    %cst_57 = arith.constant dense<0.000000e+00> : vector<2x32xf32>
    %153 = tpu.matmul %152, %151, %cst_57 {dimension_numbers = #tpu.dot_dimension_numbers<[1], [0], [0], [1], [0, 0, 1, 1], [], []>} : vector<2x16xf32>, vector<16x32xf32>, vector<2x32xf32> -> vector<2x32xf32>
    %c0_58 = arith.constant 0 : index
    %c0_59 = arith.constant 0 : index
    %154 = vector.load %arg12[%c0_58, %c0_59] : memref<32x8xf32, #tpu.memory_space<vmem>>, vector<32x8xf32>
    %cst_60 = arith.constant dense<0.000000e+00> : vector<2x8xf32>
    %155 = tpu.matmul %153, %154, %cst_60 {dimension_numbers = #tpu.dot_dimension_numbers<[1], [0], [0], [1], [0, 0, 1, 1], [], []>} : vector<2x32xf32>, vector<32x8xf32>, vector<2x8xf32> -> vector<2x8xf32>
    %c0_61 = arith.constant 0 : index
    %c0_62 = arith.constant 0 : index
    %156 = vector.load %arg13[%c0_61, %c0_62] : memref<1x8xf32, #tpu.memory_space<vmem>>, vector<1x8xf32>
    %157 = vector.broadcast %156 : vector<1x8xf32> to vector<2x8xf32>
    %158 = arith.addf %155, %157 : vector<2x8xf32>
    %c0_63 = arith.constant 0 : index
    %c0_64 = arith.constant 0 : index
    %159 = vector.load %arg15[%c0_63, %c0_64] : memref<2x8xf32, #tpu.memory_space<vmem>>, vector<2x8xf32>
    tpu.vector_store %arg15[%c0_63, %c0_64], %158 {strides = array<i32>} : memref<2x8xf32, #tpu.memory_space<vmem>>, vector<2x8xf32>,
    return
  }
  func.func @transform_0(%arg0: i32) -> (i32, i32, i32) {
    %c0_i32 = arith.constant 0 : i32
    %c0_i32_0 = arith.constant 0 : i32
    %c0_i32_1 = arith.constant 0 : i32
    return %arg0, %c0_i32, %c0_i32_0 : i32, i32, i32
  }
  func.func @transform_1(%arg0: i32) -> (i32, i32) {
    %c0_i32 = arith.constant 0 : i32
    %c0_i32_0 = arith.constant 0 : i32
    %c0_i32_1 = arith.constant 0 : i32
    return %c0_i32, %c0_i32_0 : i32, i32
  }
  func.func @transform_2(%arg0: i32) -> (i32, i32) {
    %c0_i32 = arith.constant 0 : i32
    %c0_i32_0 = arith.constant 0 : i32
    %c0_i32_1 = arith.constant 0 : i32
    return %c0_i32, %c0_i32_0 : i32, i32
  }
  func.func @transform_3(%arg0: i32) -> (i32, i32) {
    %c0_i32 = arith.constant 0 : i32
    %c0_i32_0 = arith.constant 0 : i32
    %c0_i32_1 = arith.constant 0 : i32
    return %c0_i32, %c0_i32_0 : i32, i32
  }
  func.func @transform_4(%arg0: i32) -> (i32, i32) {
    %c0_i32 = arith.constant 0 : i32
    %c0_i32_0 = arith.constant 0 : i32
    %c0_i32_1 = arith.constant 0 : i32
    return %c0_i32, %c0_i32_0 : i32, i32
  }
  func.func @transform_5(%arg0: i32) -> (i32, i32) {
    %c0_i32 = arith.constant 0 : i32
    %c0_i32_0 = arith.constant 0 : i32
    %c0_i32_1 = arith.constant 0 : i32
    return %c0_i32, %c0_i32_0 : i32, i32
  }
  func.func @transform_6(%arg0: i32) -> (i32, i32) {
    %c0_i32 = arith.constant 0 : i32
    %c0_i32_0 = arith.constant 0 : i32
    %c0_i32_1 = arith.constant 0 : i32
    return %c0_i32, %c0_i32_0 : i32, i32
  }
  func.func @transform_7(%arg0: i32) -> (i32, i32) {
    %c0_i32 = arith.constant 0 : i32
    %c0_i32_0 = arith.constant 0 : i32
    %c0_i32_1 = arith.constant 0 : i32
    return %c0_i32, %c0_i32_0 : i32, i32
  }
  func.func @transform_8(%arg0: i32) -> (i32, i32) {
    %c0_i32 = arith.constant 0 : i32
    %c0_i32_0 = arith.constant 0 : i32
    %c0_i32_1 = arith.constant 0 : i32
    return %c0_i32, %c0_i32_0 : i32, i32
  }
  func.func @transform_9(%arg0: i32) -> (i32, i32) {
    %c0_i32 = arith.constant 0 : i32
    %c0_i32_0 = arith.constant 0 : i32
    %c0_i32_1 = arith.constant 0 : i32
    return %c0_i32, %c0_i32_0 : i32, i32
  }
  func.func @transform_10(%arg0: i32) -> (i32, i32) {
    %c0_i32 = arith.constant 0 : i32
    %c0_i32_0 = arith.constant 0 : i32
    %c0_i32_1 = arith.constant 0 : i32
    return %c0_i32, %c0_i32_0 : i32, i32
  }
  func.func @transform_11(%arg0: i32) -> (i32, i32) {
    %c0_i32 = arith.constant 0 : i32
    %c0_i32_0 = arith.constant 0 : i32
    %c0_i32_1 = arith.constant 0 : i32
    return %c0_i32, %c0_i32_0 : i32, i32
  }
  func.func @transform_12(%arg0: i32) -> (i32, i32) {
    %c0_i32 = arith.constant 0 : i32
    %c0_i32_0 = arith.constant 0 : i32
    %c0_i32_1 = arith.constant 0 : i32
    return %c0_i32, %c0_i32_0 : i32, i32
  }
  func.func @transform_13(%arg0: i32) -> (i32, i32) {
    %c0_i32 = arith.constant 0 : i32
    %c0_i32_0 = arith.constant 0 : i32
    %c0_i32_1 = arith.constant 0 : i32
    return %c0_i32, %c0_i32_0 : i32, i32
  }
  func.func @transform_14(%arg0: i32) -> (i32, i32) {
    %c0_i32 = arith.constant 0 : i32
    %c0_i32_0 = arith.constant 0 : i32
    return %arg0, %c0_i32 : i32, i32
  }
}

</mosaic_0001>

<bundles_post_ra>
// kernel: tpu_custom_call.1
= control target key start
LH: loop header
LB: loop body
LE: loop exit
PB: predicated region body
PF: predicated region fallthrough
CT: control target
= control target key end

     0   :  { %19 = vsyncpa [#allocation3], 0  ;;  %s3448_s0 = inlined_call_operand.hbm [shape: f32[2,8,32], index: 0, kind: input, shape index: {}]   ;;  %s3449_s1 = inlined_call_operand.hbm [shape: f32[32,96], index: 1, kind: input, shape index: {}]   ;;  %s3450_s2 = inlined_call_operand.hbm [shape: f32[32,32], index: 2, kind: input, shape index: {}]   ;;  %s3451_s3 = inlined_call_operand.hbm [shape: f32[1,32], index: 3, kind: input, shape index: {}]   ;;  %s3452_s4 = inlined_call_operand.hbm [shape: f32[1,32], index: 4, kind: input, shape index: {}]   ;;  %s3453_s5 = inlined_call_operand.hbm [shape: f32[32,64], index: 5, kind: input, shape index: {}]   ;;  %s3454_s6 = inlined_call_operand.hbm [shape: f32[1,64], index: 6, kind: input, shape index: {}]   ;;  %s3455_s7 = inlined_call_operand.hbm [shape: f32[64,32], index: 7, kind: input, shape index: {}]   ;;  %s3456_s8 = inlined_call_operand.hbm [shape: f32[1,32], index: 8, kind: input, shape index: {}]   ;;  %s3457_s9 = inlined_call_operand.hbm [shape: f32[1,32], index: 9, kind: input, shape index: {}]   ;;  %s3458_s10 = inlined_call_operand.hbm [shape: f32[1,32], index: 10, kind: input, shape index: {}]   ;;  %s3459_s11 = inlined_call_operand.hbm [shape: f32[32,8], index: 11, kind: input, shape index: {}]   ;;  %s3460_s12 = inlined_call_operand.hbm [shape: f32[1,8], index: 12, kind: input, shape index: {}]   ;;  %s3461_s13 = inlined_call_operand.hbm [shape: f32[2,16], index: 13, kind: input, shape index: {}]   ;;  %s3462_s14 = inlined_call_operand.hbm [shape: f32[2,8], index: 14, kind: output, shape index: {}]  }
   0x1   :  { %20 = vsyncpa [#allocation6], 0 }
   0x2   :  { %21 = vsyncpa [#allocation9], 0 }
   0x3   :  { %22 = vsyncpa [#allocation12], 0 }
   0x4   :  { %23 = vsyncpa [#allocation15], 0 }
   0x5   :  { %24 = vsyncpa [#allocation18], 0 }
   0x6   :  { %25 = vsyncpa [#allocation21], 0 }
   0x7   :  { %26 = vsyncpa [#allocation24], 0 }
   0x8   :  { %27 = vsyncpa [#allocation4], 0  ;;  %s2959_s29 = smov [#allocation5]   ;;  %s2960_s15 = smov [#allocation8]  }
   0x9   :  { %s45_s30 = sshll.u32 %s2959_s29, 4  ;;  %s70_s16 = sshll.u32 %s2960_s15, 4  ;;  %s46_s30 = int_to_ptr.vmem [resolvable:$true] %s45_s30  ;;  %s3067_s16 = int_to_ptr.vmem [resolvable:$true] %s70_s16 }
   0xa   :  { %s2611_s19 = scalar_lea.hbm %s3449_s1, 512 }
   0xb   :  { %p2612_p0 = scmp.ne.s32.totalorder %s3449_s1, %s2611_s19  ;;  %p2615_p1 = scmp.lt.u32.totalorder %s2611_s19, %s3449_s1 }
   0xd   :  { %p2617_p2 = pnand %p2615_p1, %p2612_p0 }
   0xf   :  { %2620 = shalt.err (!%p2617_p2)
}
  0x10   :  { %s2621_s24 = scalar_lea.vmem %s46_s30, 512  ;;  %p2626_p4 = scmp.lt.s32.totalorder %s46_s30, %s46_s30 }
  0x11   :  { %p2622_p3 = scmp.ne.s32.totalorder %s46_s30, %s2621_s24  ;;  %p2627_p5 = scmp.lt.s32.totalorder %s2621_s24, %s2621_s24 }
  0x13   :  { %p2628_p6 = por %p2627_p5, %p2626_p4 }
  0x15   :  { %p2629_p7 = pnand %p2628_p6, %p2622_p3 }
  0x17   :  { %2632 = shalt.err (!%p2629_p7)
}
  0x18   :  { %s2961_s25 = smov 128   ;;  %s2962_s26 = smov 8  }
  0x19   :  { %51 = dma.hbm_to_vmem [thread:$0]  %s3449_s1, 512, %s46_s30, [#allocation6], %s2961_s25, %s2961_s25, %s2962_s26  }
  0x1a   :  { %s2633_s17 = scalar_lea.hbm %s3451_s3, 16 }
  0x1b   :  { %p2634_p8 = scmp.ne.s32.totalorder %s3451_s3, %s2633_s17  ;;  %p2637_p9 = scmp.lt.u32.totalorder %s2633_s17, %s3451_s3 }
  0x1d   :  { %p2639_p10 = pnand %p2637_p9, %p2634_p8 }
  0x1f   :  { %2642 = shalt.err (!%p2639_p10)
}
  0x20   :  { %s2643_s22 = scalar_lea.vmem %s3067_s16, 16  ;;  %s2647_s1 = scalar_lea.vmem %s3067_s16, 32 }
  0x21   :  { %p2644_p11 = scmp.ne.s32.totalorder %s3067_s16, %s2643_s22  ;;  %p2648_p12 = scmp.lt.s32.totalorder %s3067_s16, %s3067_s16 }
  0x22   :  { %p2649_p13 = scmp.lt.s32.totalorder %s2647_s1, %s2643_s22 }
  0x24   :  { %p2650_p0 = por %p2649_p13, %p2648_p12 }
  0x26   :  { %p2651_p1 = pnand %p2650_p0, %p2644_p11 }
  0x28   :  { %2654 = shalt.err (!%p2651_p1)
}
  0x29   :  { %73 = dma.hbm_to_vmem [thread:$0]  %s3451_s3, 16, %s3067_s16, [#allocation9]  }
  0x2a   :  { %s2963_s24 = smov [#allocation11]   ;;  %s2964_s28 = smov [#allocation14]  }
  0x2b   :  { %s89_s27 = sshll.u32 %s2963_s24, 4  ;;  %s111_s29 = sshll.u32 %s2964_s28, 4  ;;  %s90_s27 = int_to_ptr.vmem [resolvable:$true] %s89_s27  ;;  %s3102_s29 = int_to_ptr.vmem [resolvable:$true] %s111_s29 }
  0x2c   :  { %s2655_s18 = scalar_lea.hbm %s3453_s5, 512 }
  0x2d   :  { %p2656_p2 = scmp.ne.s32.totalorder %s3453_s5, %s2655_s18  ;;  %p2659_p3 = scmp.lt.u32.totalorder %s2655_s18, %s3453_s5 }
  0x2f   :  { %p2661_p4 = pnand %p2659_p3, %p2656_p2 }
  0x31   :  { %2664 = shalt.err (!%p2661_p4)
}
  0x32   :  { %s2665_s3 = scalar_lea.vmem %s90_s27, 512  ;;  %p2670_p6 = scmp.lt.s32.totalorder %s90_s27, %s90_s27 }
  0x33   :  { %p2666_p5 = scmp.ne.s32.totalorder %s90_s27, %s2665_s3  ;;  %p2671_p7 = scmp.lt.s32.totalorder %s2665_s3, %s2665_s3 }
  0x35   :  { %p2672_p8 = por %p2671_p7, %p2670_p6 }
  0x37   :  { %p2673_p9 = pnand %p2672_p8, %p2666_p5 }
  0x39   :  { %2676 = shalt.err (!%p2673_p9)
}
  0x3a   :  { %95 = dma.hbm_to_vmem [thread:$0]  %s3453_s5, 512, %s90_s27, [#allocation12], %s2961_s25, %s2961_s25, %s2962_s26  }
  0x3b   :  { %s2677_s24 = scalar_lea.hbm %s3455_s7, 1024 }
  0x3c   :  { %p2678_p10 = scmp.ne.s32.totalorder %s3455_s7, %s2677_s24  ;;  %p2681_p11 = scmp.lt.u32.totalorder %s2677_s24, %s3455_s7 }
  0x3e   :  { %p2683_p12 = pnand %p2681_p11, %p2678_p10 }
  0x40   :  { %2686 = shalt.err (!%p2683_p12)
}
  0x41   :  { %s2687_s19 = scalar_lea.vmem %s3102_s29, 1024  ;;  %p2692_p0 = scmp.lt.s32.totalorder %s3102_s29, %s3102_s29 }
  0x42   :  { %p2688_p13 = scmp.ne.s32.totalorder %s3102_s29, %s2687_s19  ;;  %p2693_p1 = scmp.lt.s32.totalorder %s2687_s19, %s2687_s19 }
  0x44   :  { %p2694_p2 = por %p2693_p1, %p2692_p0 }
  0x46   :  { %p2695_p3 = pnand %p2694_p2, %p2688_p13 }
  0x48   :  { %2698 = shalt.err (!%p2695_p3)
}
  0x49   :  { %117 = dma.hbm_to_vmem [thread:$0]  %s3455_s7, 1024, %s3102_s29, [#allocation15], %s2961_s25, %s2961_s25, %s2962_s26  }
  0x4a   :  { %s2965_s20 = smov [#allocation17]   ;;  %s2966_s22 = smov [#allocation20]  }
  0x4b   :  { %s134_s21 = sshll.u32 %s2965_s20, 4  ;;  %s153_s3 = sshll.u32 %s2966_s22, 4  ;;  %s135_s21 = int_to_ptr.vmem [resolvable:$true] %s134_s21  ;;  %s3139_s3 = int_to_ptr.vmem [resolvable:$true] %s153_s3 }
  0x4c   :  { %s2699_s30 = scalar_lea.hbm %s3457_s9, 16 }
  0x4d   :  { %p2700_p4 = scmp.ne.s32.totalorder %s3457_s9, %s2699_s30  ;;  %p2703_p5 = scmp.lt.u32.totalorder %s2699_s30, %s3457_s9 }
  0x4f   :  { %p2705_p6 = pnand %p2703_p5, %p2700_p4 }
  0x51   :  { %2708 = shalt.err (!%p2705_p6)
}
  0x52   :  { %s2709_s7 = scalar_lea.vmem %s135_s21, 16  ;;  %s2713_s29 = scalar_lea.vmem %s135_s21, 32 }
  0x53   :  { %p2710_p7 = scmp.ne.s32.totalorder %s135_s21, %s2709_s7  ;;  %p2714_p8 = scmp.lt.s32.totalorder %s135_s21, %s135_s21 }
  0x54   :  { %p2715_p9 = scmp.lt.s32.totalorder %s2713_s29, %s2709_s7 }
  0x56   :  { %p2716_p10 = por %p2715_p9, %p2714_p8 }
  0x58   :  { %p2717_p11 = pnand %p2716_p10, %p2710_p7 }
  0x5a   :  { %2720 = shalt.err (!%p2717_p11)
}
  0x5b   :  { %137 = dma.hbm_to_vmem [thread:$0]  %s3457_s9, 16, %s135_s21, [#allocation18]  }
  0x5c   :  { %s2721_s27 = scalar_lea.hbm %s3459_s11, 512 }
  0x5d   :  { %p2722_p12 = scmp.ne.s32.totalorder %s3459_s11, %s2721_s27  ;;  %p2725_p13 = scmp.lt.u32.totalorder %s2721_s27, %s3459_s11 }
  0x5f   :  { %p2727_p0 = pnand %p2725_p13, %p2722_p12 }
  0x61   :  { %2730 = shalt.err (!%p2727_p0)
}
  0x62   :  { %s2731_s30 = scalar_lea.vmem %s3139_s3, 512  ;;  %p2736_p2 = scmp.lt.s32.totalorder %s3139_s3, %s3139_s3 }
  0x63   :  { %p2732_p1 = scmp.ne.s32.totalorder %s3139_s3, %s2731_s30  ;;  %p2737_p3 = scmp.lt.s32.totalorder %s2731_s30, %s2731_s30 }
  0x65   :  { %p2738_p4 = por %p2737_p3, %p2736_p2 }
  0x67   :  { %p2739_p5 = pnand %p2738_p4, %p2732_p1 }
  0x69   :  { %2742 = shalt.err (!%p2739_p5)
}
  0x6a   :  { %159 = dma.hbm_to_vmem [thread:$0]  %s3459_s11, 512, %s3139_s3, [#allocation21], %s2961_s25, %s2961_s25, %s2962_s26  }
  0x6b   :  { %s2967_s23 = smov [#allocation2]   ;;  %s2968_s28 = smov [#allocation7]  }
  0x6c   :  { %s33_s24 = sshll.u32 %s2967_s23, 4  ;;  %s57_s15 = sshll.u32 %s2968_s28, 4  ;;  %s34_s24 = int_to_ptr.vmem [resolvable:$true] %s33_s24  ;;  %s3173_s15 = int_to_ptr.vmem [resolvable:$true] %s57_s15 }
  0x6d   :  { %s2743_s17 = scalar_lea.hbm %s3448_s0, 256 }
  0x6e   :  { %p2744_p6 = scmp.ne.s32.totalorder %s3448_s0, %s2743_s17  ;;  %p2747_p7 = scmp.lt.u32.totalorder %s2743_s17, %s3448_s0 }
  0x70   :  { %p2749_p8 = pnand %p2747_p7, %p2744_p6 }
  0x72   :  { %2752 = shalt.err (!%p2749_p8)
}
  0x73   :  { %s2753_s11 = scalar_lea.vmem %s34_s24, 256  ;;  %p2758_p10 = scmp.lt.s32.totalorder %s34_s24, %s34_s24 }
  0x74   :  { %p2754_p9 = scmp.ne.s32.totalorder %s34_s24, %s2753_s11  ;;  %p2759_p11 = scmp.lt.s32.totalorder %s2753_s11, %s2753_s11 }
  0x76   :  { %p2760_p12 = por %p2759_p11, %p2758_p10 }
  0x78   :  { %p2761_p13 = pnand %p2760_p12, %p2754_p9 }
  0x7a   :  { %2764 = shalt.err (!%p2761_p13)
}
  0x7b   :  { %39 = dma.hbm_to_vmem [thread:$0]  %s3448_s0, 256, %s34_s24, [#allocation3], %s2961_s25, %s2961_s25, %s2962_s26  }
  0x7c   :  { %s2765_s1 = scalar_lea.hbm %s3450_s2, 512 }
  0x7d   :  { %p2766_p0 = scmp.ne.s32.totalorder %s3450_s2, %s2765_s1  ;;  %p2769_p1 = scmp.lt.u32.totalorder %s2765_s1, %s3450_s2 }
  0x7f   :  { %p2771_p2 = pnand %p2769_p1, %p2766_p0 }
  0x81   :  { %2774 = shalt.err (!%p2771_p2)
}
  0x82   :  { %s2775_s28 = scalar_lea.vmem %s3173_s15, 512  ;;  %p2780_p4 = scmp.lt.s32.totalorder %s3173_s15, %s3173_s15 }
  0x83   :  { %p2776_p3 = scmp.ne.s32.totalorder %s3173_s15, %s2775_s28  ;;  %p2781_p5 = scmp.lt.s32.totalorder %s2775_s28, %s2775_s28 }
  0x85   :  { %p2782_p6 = por %p2781_p5, %p2780_p4 }
  0x87   :  { %p2783_p7 = pnand %p2782_p6, %p2776_p3 }
  0x89   :  { %2786 = shalt.err (!%p2783_p7)
}
  0x8a   :  { %63 = dma.hbm_to_vmem [thread:$0]  %s3450_s2, 512, %s3173_s15, [#allocation6], %s2961_s25, %s2961_s25, %s2962_s26  }
  0x8b   :  { %s2969_s7 = smov [#allocation10]   ;;  %s2970_s17 = smov [#allocation13]  }
  0x8c   :  { %s80_s29 = sshll.u32 %s2969_s7, 4  ;;  %s102_s18 = sshll.u32 %s2970_s17, 4  ;;  %s81_s29 = int_to_ptr.vmem [resolvable:$true] %s80_s29  ;;  %s103_s18 = int_to_ptr.vmem [resolvable:$true] %s102_s18 }
  0x8d   :  { %s2787_s27 = scalar_lea.hbm %s3452_s4, 16 }
  0x8e   :  { %p2788_p8 = scmp.ne.s32.totalorder %s3452_s4, %s2787_s27  ;;  %p2791_p9 = scmp.lt.u32.totalorder %s2787_s27, %s3452_s4 }
  0x90   :  { %p2793_p10 = pnand %p2791_p9, %p2788_p8 }
  0x92   :  { %2796 = shalt.err (!%p2793_p10)
}
  0x93   :  { %s2797_s2 = scalar_lea.vmem %s81_s29, 16  ;;  %s2801_s25 = scalar_lea.vmem %s81_s29, 32 }
  0x94   :  { %p2798_p11 = scmp.ne.s32.totalorder %s81_s29, %s2797_s2  ;;  %p2802_p12 = scmp.lt.s32.totalorder %s81_s29, %s81_s29 }
  0x95   :  { %p2803_p13 = scmp.lt.s32.totalorder %s2801_s25, %s2797_s2 }
  0x97   :  { %p2804_p0 = por %p2803_p13, %p2802_p12 }
  0x99   :  { %p2805_p1 = pnand %p2804_p0, %p2798_p11 }
  0x9b   :  { %2808 = shalt.err (!%p2805_p1)
}
  0x9c   :  { %83 = dma.hbm_to_vmem [thread:$0]  %s3452_s4, 16, %s81_s29, [#allocation9]  }
  0x9d   :  { %s2809_s9 = scalar_lea.hbm %s3454_s6, 16 }
  0x9e   :  { %p2810_p2 = scmp.ne.s32.totalorder %s3454_s6, %s2809_s9  ;;  %p2813_p3 = scmp.lt.u32.totalorder %s2809_s9, %s3454_s6 }
  0xa0   :  { %p2815_p4 = pnand %p2813_p3, %p2810_p2 }
  0xa2   :  { %2818 = shalt.err (!%p2815_p4)
}
  0xa3   :  { %s2819_s24 = scalar_lea.vmem %s103_s18, 16  ;;  %s2823_s7 = scalar_lea.vmem %s103_s18, 32 }
  0xa4   :  { %p2820_p5 = scmp.ne.s32.totalorder %s103_s18, %s2819_s24  ;;  %p2824_p6 = scmp.lt.s32.totalorder %s103_s18, %s103_s18 }
  0xa5   :  { %p2825_p7 = scmp.lt.s32.totalorder %s2823_s7, %s2819_s24 }
  0xa7   :  { %p2826_p8 = por %p2825_p7, %p2824_p6 }
  0xa9   :  { %p2827_p9 = pnand %p2826_p8, %p2820_p5 }
  0xab   :  { %2830 = shalt.err (!%p2827_p9)
}
  0xac   :  { %105 = dma.hbm_to_vmem [thread:$0]  %s3454_s6, 16, %s103_s18, [#allocation12]  }
  0xad   :  { %s2971_s17 = smov [#allocation16]   ;;  %s2972_s5 = smov [#allocation19]  }
  0xae   :  { %s124_s19 = sshll.u32 %s2971_s17, 4  ;;  %s144_s27 = sshll.u32 %s2972_s5, 4  ;;  %s125_s19 = int_to_ptr.vmem [resolvable:$true] %s124_s19  ;;  %s145_s27 = int_to_ptr.vmem [resolvable:$true] %s144_s27 }
  0xaf   :  { %s2831_s20 = scalar_lea.hbm %s3456_s8, 16 }
  0xb0   :  { %p2832_p10 = scmp.ne.s32.totalorder %s3456_s8, %s2831_s20  ;;  %p2835_p11 = scmp.lt.u32.totalorder %s2831_s20, %s3456_s8 }
  0xb2   :  { %p2837_p12 = pnand %p2835_p11, %p2832_p10 }
  0xb4   :  { %2840 = shalt.err (!%p2837_p12)
}
  0xb5   :  { %s2841_s6 = scalar_lea.vmem %s125_s19, 16  ;;  %s2845_s18 = scalar_lea.vmem %s125_s19, 32 }
  0xb6   :  { %p2842_p13 = scmp.ne.s32.totalorder %s125_s19, %s2841_s6  ;;  %p2846_p0 = scmp.lt.s32.totalorder %s125_s19, %s125_s19 }
  0xb7   :  { %p2847_p1 = scmp.lt.s32.totalorder %s2845_s18, %s2841_s6 }
  0xb9   :  { %p2848_p2 = por %p2847_p1, %p2846_p0 }
  0xbb   :  { %p2849_p3 = pnand %p2848_p2, %p2842_p13 }
  0xbd   :  { %2852 = shalt.err (!%p2849_p3)
}
  0xbe   :  { %127 = dma.hbm_to_vmem [thread:$0]  %s3456_s8, 16, %s125_s19, [#allocation15]  }
  0xbf   :  { %s2853_s21 = scalar_lea.hbm %s3458_s10, 16 }
  0xc0   :  { %p2854_p4 = scmp.ne.s32.totalorder %s3458_s10, %s2853_s21  ;;  %p2857_p5 = scmp.lt.u32.totalorder %s2853_s21, %s3458_s10 }
  0xc2   :  { %p2859_p6 = pnand %p2857_p5, %p2854_p4 }
  0xc4   :  { %2862 = shalt.err (!%p2859_p6)
}
  0xc5   :  { %s2863_s7 = scalar_lea.vmem %s145_s27, 16  ;;  %s2867_s4 = scalar_lea.vmem %s145_s27, 32 }
  0xc6   :  { %p2864_p7 = scmp.ne.s32.totalorder %s145_s27, %s2863_s7  ;;  %p2868_p8 = scmp.lt.s32.totalorder %s145_s27, %s145_s27 }
  0xc7   :  { %p2869_p9 = scmp.lt.s32.totalorder %s2867_s4, %s2863_s7 }
  0xc9   :  { %p2870_p10 = por %p2869_p9, %p2868_p8 }
  0xcb   :  { %p2871_p11 = pnand %p2870_p10, %p2864_p7 }
  0xcd   :  { %2874 = shalt.err (!%p2871_p11)
}
  0xce   :  { %147 = dma.hbm_to_vmem [thread:$0]  %s3458_s10, 16, %s145_s27, [#allocation18]  }
  0xcf   :  { %s2973_s17 = smov [#allocation22]   ;;  %s2974_s5 = smov [#allocation23]  }
  0xd0   :  { %s166_s19 = sshll.u32 %s2973_s17, 4  ;;  %s176_s11 = sshll.u32 %s2974_s5, 4  ;;  %s167_s19 = int_to_ptr.vmem [resolvable:$true] %s166_s19  ;;  %s177_s11 = int_to_ptr.vmem [resolvable:$true] %s176_s11 }
  0xd1   :  { %s2875_s22 = scalar_lea.hbm %s3460_s12, 16 }
  0xd2   :  { %p2876_p12 = scmp.ne.s32.totalorder %s3460_s12, %s2875_s22  ;;  %p2879_p13 = scmp.lt.u32.totalorder %s2875_s22, %s3460_s12 }
  0xd4   :  { %p2881_p0 = pnand %p2879_p13, %p2876_p12 }
  0xd6   :  { %2884 = shalt.err (!%p2881_p0)
}
  0xd7   :  { %s2885_s10 = scalar_lea.vmem %s167_s19, 16  ;;  %s2889_s27 = scalar_lea.vmem %s167_s19, 32 }
  0xd8   :  { %p2886_p1 = scmp.ne.s32.totalorder %s167_s19, %s2885_s10  ;;  %p2890_p2 = scmp.lt.s32.totalorder %s167_s19, %s167_s19 }
  0xd9   :  { %p2891_p3 = scmp.lt.s32.totalorder %s2889_s27, %s2885_s10 }
  0xdb   :  { %p2892_p4 = por %p2891_p3, %p2890_p2 }
  0xdd   :  { %p2893_p5 = pnand %p2892_p4, %p2886_p1 }
  0xdf   :  { %2896 = shalt.err (!%p2893_p5)
}
  0xe0   :  { %169 = dma.hbm_to_vmem [thread:$0]  %s3460_s12, 16, %s167_s19, [#allocation21]  }
  0xe1   :  { %s2897_s9 = scalar_lea.hbm %s3461_s13, 32 }
  0xe2   :  { %p2898_p6 = scmp.ne.s32.totalorder %s3461_s13, %s2897_s9  ;;  %p2901_p7 = scmp.lt.u32.totalorder %s2897_s9, %s3461_s13 }
  0xe4   :  { %p2903_p8 = pnand %p2901_p7, %p2898_p6 }
  0xe6   :  { %2906 = shalt.err (!%p2903_p8)
}
  0xe7   :  { %s2907_s24 = scalar_lea.vmem %s177_s11, 32  ;;  %p2912_p10 = scmp.lt.s32.totalorder %s177_s11, %s177_s11 }
  0xe8   :  { %p2908_p9 = scmp.ne.s32.totalorder %s177_s11, %s2907_s24  ;;  %p2913_p11 = scmp.lt.s32.totalorder %s2907_s24, %s2907_s24 }
  0xea   :  { %p2914_p12 = por %p2913_p11, %p2912_p10 }
  0xec   :  { %p2915_p13 = pnand %p2914_p12, %p2908_p9 }
  0xee   :  { %2918 = shalt.err (!%p2915_p13)
}
  0xef   :  { %179 = dma.hbm_to_vmem [thread:$0]  %s3461_s13, 32, %s177_s11, [#allocation24]  }
  0xf0   :  { %2941 = dma.done.wait [#allocation3], 256  }
  0xf1   :  { %2942 = vsyncadd [#allocation3], 4294967040 }
  0xf2   :  { %2943 = dma.done.wait [#allocation6], 1024  }
  0xf3   :  { %2944 = vsyncadd [#allocation6], 4294966272 }
  0xf4   :  { %2945 = dma.done.wait [#allocation9], 32  }
  0xf5   :  { %2946 = vsyncadd [#allocation9], 4294967264 }
  0xf6   :  { %2947 = dma.done.wait [#allocation12], 528  }
  0xf7   :  { %2948 = vsyncadd [#allocation12], 4294966768 }
  0xf8   :  { %2949 = dma.done.wait [#allocation15], 1040  }
  0xf9   :  { %2950 = vsyncadd [#allocation15], 4294966256 }
  0xfa   :  { %2951 = dma.done.wait [#allocation18], 32  }
  0xfb   :  { %2952 = vsyncadd [#allocation18], 4294967264 }
  0xfc   :  { %2953 = dma.done.wait [#allocation21], 528  }
  0xfd   :  { %2954 = vsyncadd [#allocation21], 4294966768 }
  0xfe   :  { %2955 = dma.done.wait [#allocation24], 32  }
  0xff   :  { %2956 = vsyncadd [#allocation24], 4294967264  ;;  %vm228_vm0 = vcmask 261120   ;;  %v224_v0 = vld [vmem:[#allocation5] sm:$0xff]  ;;  %v225_v1 = vld [vmem:[#allocation5 + $0x8] sm:$0xff]  ;;  %v2975_v8 = vmov 0.0  }
 0x100   :  { %v226_v2 = vld [vmem:[#allocation5 + $0x10] sm:$0xff]  ;;  %v2485_v3 = vpack.c.bf16 %v225_v1, %v224_v0  ;;  %v227_v4 = vld [vmem:[#allocation5 + $0x18] sm:$0xff]  ;;  %2346 = vmatprep.subr.mxu1 %v2975_v8  ;;  %vm2976_vm1 = vmmov 0   ;;  %s2977_s13 = smov 96   ;;  %vm313_vm2 = vcmask 64512   ;;  %s2978_s4 = smov 64  }
 0x101   :  { %v222_v5 = vld [vmem:[#allocation2] sm:$0xff]  ;;  %v2489_v6 = vpack.c.bf16 %v227_v4, %v226_v2  ;;  %v223_v7 = vld [vmem:[#allocation2 + $0x8] sm:$0xff]  ;;  %2348 = vmatprep.mubr.msk.f32.mxu1 %vm2976_vm1, %v2975_v8  ;;  %s2979_s8 = smov 88   ;;  %s2980_s29 = smov 120   ;;  %vm1658_vm3 = vcmask 195584   ;;  %vm1655_vm4 = vcmask 130048  }
 0x102   :  { %2343 = vmatprep.mubr.msk.f32.mxu0 %vm228_vm0, %v222_v5  ;;  %2486 = vmatprep.subr.bf16.mxu0 %v2485_v3  ;;  %s2981_s17 = smov 56   ;;  %s2982_s19 = smov 80   ;;  %vm1916_vm5 = vcmask 523264   ;;  %vm2202_vm6 = vcmask 58368  }
 0x103   :  { %2488 = vmatpush3.bf16.msra.mxu0 %v2485_v3  ;;  %s2983_s5 = smov 112   ;;  %s2984_s11 = smov 48  }
 0x104   :  { %2490 = vmatprep.subr.bf16.mxu0 %v2489_v6  ;;  %s2985_s3 = smov 72   ;;  %s2986_s20 = smov 104  }
 0x105   :  { %s2987_s22 = smov 40   ;;  %s2988_s2 = smov 16  }
 0x106   :  { %s2991_s25 = smov [#allocation25]  }
 0x107   :  { %2492 = vmatpush3.bf16.msra.mxu0 %v2489_v6  ;;  %s2210_s15 = sshll.u32 %s2991_s25, 4  ;;  %s2211_s15 = int_to_ptr.vmem [resolvable:$true] %s2210_s15 }
 0x108   :  { %2356 = vmatprep.subr.mxu0 %v2975_v8  ;;  %s2919_s6 = scalar_lea.vmem %s2211_s15, 32  ;;  %p2924_p1 = scmp.lt.s32.totalorder %s2211_s15, %s2211_s15 }
 0x109   :  { %p2920_p0 = scmp.ne.s32.totalorder %s2211_s15, %s2919_s6  ;;  %p2925_p2 = scmp.lt.s32.totalorder %s2919_s6, %s2919_s6 }
 0x10a   :  { %2344 = vmatmul.mubr.msk.f32.vlgmr.msra.gmra.mrb[0].mxu0 %vm228_vm0, %v223_v7 }
 0x10b   :  { %2358 = vmatprep.mubr.msk.f32.mxu0 %vm2976_vm1, %v2975_v8  ;;  %p2926_p3 = por %p2925_p2, %p2924_p1 }
 0x10d   :  { %p2927_p4 = pnand %p2926_p3, %p2920_p0 }
 0x1dd   :  { %v3290_v9 = vpop.f32.mrb[0].mxu0 }
 0x1de   :  { %v3292_v10 = vpop.f32.mrb[1].mxu0 }
 0x1df   :  { %311 = vrot.lane.b32.xlu0 %v3292_v10, %s2977_s13 }
 0x1e3   :  { %389 = vrot.lane.b32.xlu0 %v3290_v9, %s2977_s13 }
 0x251   :  { %v312_v11 = vpop.permute.xlu0 %311 }
 0x252   :  { %2347 = vmatpush3.xpose.msk.msra.mxu1 %vm313_vm2, %v312_v11 }
 0x253   :  { %2351 = vmatprep.subr.mxu1 %v2975_v8 }
 0x255   :  { %2349 = vmatmul.mubr.msk.f32.vlgmr.msra.gmra.mrb[0].mxu1 %vm313_vm2, %v3292_v10  ;;  %v390_v12 = vpop.permute.xlu0 %389 }
 0x256   :  { %2352 = vmatpush3.xpose.msk.msra.mxu1 %vm313_vm2, %v390_v12  ;;  %2353 = vmatprep.mubr.msk.f32.mxu1 %vm2976_vm1, %v2975_v8 }
 0x257   :  { %2361 = vmatprep.subr.mxu1 %v2975_v8 }
 0x259   :  { %2354 = vmatmul.mubr.msk.f32.vlgmr.msra.gmra.mrb[2].mxu1 %vm313_vm2, %v3290_v9 }
 0x25a   :  { %2363 = vmatprep.mubr.msk.f32.mxu1 %vm2976_vm1, %v2975_v8 }
 0x328   :  { %v384_v13 = vpop.f32.mrb[0].mxu1 }
 0x329   :  { %v2350_v14 = vpop.f32.mrb[1].mxu1  ;;  %v465_v15 = vsel %vm313_vm2, %v384_v13, -inf }
 0x32a   :  { %466 = vmax.xlane.f32.xlu1 %v465_v15 }
 0x32c   :  { %v461_v16 = vpop.f32.mrb[2].mxu1 }
 0x32d   :  { %v2355_v17 = vpop.f32.mrb[3].mxu1  ;;  %v468_v18 = vsel %vm313_vm2, %v461_v16, -inf }
 0x32e   :  { %469 = vmax.xlane.f32.xlu1 %v468_v18 }
 0x33f   :  { %487 = vrot.lane.b32.xlu1 %v3292_v10, %s2978_s4 }
 0x343   :  { %563 = vrot.lane.b32.xlu1 %v3290_v9, %s2978_s4 }
 0x347   :  { %641 = vrot.lane.b32.xlu1 %v3292_v10, %s2979_s8 }
 0x34b   :  { %719 = vrot.lane.b32.xlu1 %v3290_v9, %s2979_s8 }
 0x3b7   :  { %v467_v19 = vpop.xlane.xlu1 %466 }
 0x3b8   :  { %v471_v20 = vsub.f32 %v384_v13, %v467_v19 }
 0x3ba   :  { %v473_v21 = vmul.f32 1.442695, %v471_v20 }
 0x3bb   :  { %v470_v22 = vpop.xlane.xlu1 %469 }
 0x3bc   :  { %2567 = vpow2.f32 %v473_v21  ;;  %v472_v23 = vsub.f32 %v461_v16, %v470_v22 }
 0x3be   :  { %v475_v24 = vmul.f32 1.442695, %v472_v23 }
 0x3bf   :  { %v488_v25 = vpop.permute.xlu1 %487 }
 0x3c0   :  { %2569 = vpow2.f32 %v475_v24  ;;  %2357 = vmatpush3.msra.mxu0 %v488_v25 }
 0x3c1   :  { %2366 = vmatprep.subr.mxu0 %v2975_v8 }
 0x3c3   :  { %v564_v26 = vpop.permute.xlu1 %563 }
 0x3c4   :  { %2362 = vmatpush3.msra.mxu1 %v564_v26 }
 0x3c5   :  { %2371 = vmatprep.subr.mxu1 %v2975_v8 }
 0x3c6   :  { %v2568_v27 = vpop.eup %2567 }
 0x3c7   :  { %v477_v28 = vsel %vm313_vm2, %v2568_v27, 0.0  ;;  %v642_v31 = vpop.permute.xlu1 %641 }
 0x3c8   :  { %478 = vadd.xlane.f32.xlu0 %v477_v28 }
 0x3ca   :  { %v2570_v29 = vpop.eup %2569 }
 0x3cb   :  { %v480_v30 = vsel %vm313_vm2, %v2570_v29, 0.0  ;;  %v720_v32 = vpop.permute.xlu1 %719 }
 0x3cc   :  { %481 = vadd.xlane.f32.xlu1 %v480_v30 }
 0x3dd   :  { %717 = vrot.lane.b32.xlu1 %v3290_v9, %s2980_s29 }
 0x3de   :  { %639 = vrot.lane.b32.xlu0 %v3292_v10, %s2980_s29 }
 0x455   :  { %v479_v33 = vpop.xlane.xlu0 %478 }
 0x456   :  { %2571 = vrcp.f32 %v479_v33 }
 0x459   :  { %v482_v34 = vpop.xlane.xlu1 %481  ;;  %v640_v39 = vpop.permute.xlu0 %639 }
 0x45a   :  { %2573 = vrcp.f32 %v482_v34 }
 0x45d   :  { %v718_v40 = vpop.permute.xlu1 %717 }
 0x460   :  { %v2572_v35 = vpop.eup %2571 }
 0x461   :  { %v484_v36 = vmul.f32 %v2572_v35, %v2568_v27 }
 0x463   :  { %2359 = vmatmul.mubr.msk.f32.vlgmr.msra.gmra.mrb[2].mxu0 %vm313_vm2, %v484_v36 }
 0x464   :  { %v2574_v37 = vpop.eup %2573  ;;  %2367 = vmatpush3.xpose.msk.msra.mxu0 %vm313_vm2, %v642_v31  ;;  %2368 = vmatprep.mubr.msk.f32.mxu0 %vm2976_vm1, %v2975_v8 }
 0x465   :  { %v486_v38 = vmul.f32 %v2574_v37, %v2570_v29  ;;  %2376 = vmatprep.subr.mxu0 %v2975_v8 }
 0x467   :  { %2364 = vmatmul.mubr.msk.f32.vlgmr.msra.gmra.mrb[4].mxu1 %vm313_vm2, %v486_v38  ;;  %2369 = vmatmul.mubr.msk.f32.vlgmr.msra.gmra.mrb[4].mxu0 %vm313_vm2, %v640_v39 }
 0x468   :  { %2372 = vmatpush3.xpose.msk.msra.mxu1 %vm313_vm2, %v720_v32  ;;  %2373 = vmatprep.mubr.msk.f32.mxu1 %vm2976_vm1, %v2975_v8 }
 0x469   :  { %2381 = vmatprep.subr.mxu1 %v2975_v8  ;;  %2378 = vmatprep.mubr.msk.f32.mxu0 %vm2976_vm1, %v2975_v8 }
 0x46b   :  { %2374 = vmatmul.mubr.msk.f32.vlgmr.msra.gmra.mrb[6].mxu1 %vm313_vm2, %v718_v40 }
 0x46c   :  { %2383 = vmatprep.mubr.msk.f32.mxu1 %vm2976_vm1, %v2975_v8 }
 0x536   :  { %v3336_v41 = vpop.f32.mrb[2].mxu0 }
 0x537   :  { %v2360_v42 = vpop.f32.mrb[3].mxu0 }
 0x53a   :  { %v3338_v43 = vpop.f32.mrb[4].mxu1  ;;  %v713_v44 = vpop.f32.mrb[4].mxu0 }
 0x53b   :  { %v2365_v45 = vpop.f32.mrb[5].mxu1  ;;  %v2370_v46 = vpop.f32.mrb[5].mxu0  ;;  %v795_v47 = vsel %vm313_vm2, %v713_v44, -inf }
 0x53c   :  { %796 = vmax.xlane.f32.xlu1 %v795_v47 }
 0x53e   :  { %v791_v48 = vpop.f32.mrb[6].mxu1 }
 0x53f   :  { %v2375_v49 = vpop.f32.mrb[7].mxu1  ;;  %v798_v50 = vsel %vm313_vm2, %v791_v48, -inf }
 0x540   :  { %799 = vmax.xlane.f32.xlu0 %v798_v50 }
 0x54d   :  { %817 = vrot.lane.b32.xlu1 %v3292_v10, %s2981_s17 }
 0x551   :  { %971 = vrot.lane.b32.xlu1 %v3292_v10, %s2982_s19 }
 0x555   :  { %1049 = vrot.lane.b32.xlu1 %v3290_v9, %s2982_s19 }
 0x556   :  { %893 = vrot.lane.b32.xlu0 %v3290_v9, %s2981_s17 }
 0x55a   :  { %969 = vrot.lane.b32.xlu0 %v3292_v10, %s2983_s5 }
 0x5c9   :  { %v797_v51 = vpop.xlane.xlu1 %796 }
 0x5ca   :  { %v801_v52 = vsub.f32 %v713_v44, %v797_v51 }
 0x5cc   :  { %v803_v53 = vmul.f32 1.442695, %v801_v52 }
 0x5cd   :  { %v818_v54 = vpop.permute.xlu1 %817  ;;  %v800_v55 = vpop.xlane.xlu0 %799 }
 0x5ce   :  { %2575 = vpow2.f32 %v803_v53  ;;  %v802_v56 = vsub.f32 %v791_v48, %v800_v55  ;;  %2377 = vmatpush3.msra.mxu0 %v818_v54 }
 0x5cf   :  { %2386 = vmatprep.subr.mxu0 %v2975_v8 }
 0x5d0   :  { %v805_v57 = vmul.f32 1.442695, %v802_v56 }
 0x5d1   :  { %v894_v58 = vpop.permute.xlu0 %893  ;;  %v972_v63 = vpop.permute.xlu1 %971 }
 0x5d2   :  { %2577 = vpow2.f32 %v805_v57  ;;  %2382 = vmatpush3.msra.mxu1 %v894_v58 }
 0x5d3   :  { %2391 = vmatprep.subr.mxu1 %v2975_v8 }
 0x5d5   :  { %v1050_v0 = vpop.permute.xlu1 %1049  ;;  %v970_v7 = vpop.permute.xlu0 %969 }
 0x5d8   :  { %v2576_v59 = vpop.eup %2575 }
 0x5d9   :  { %v807_v60 = vsel %vm313_vm2, %v2576_v59, 0.0 }
 0x5da   :  { %808 = vadd.xlane.f32.xlu1 %v807_v60 }
 0x5dc   :  { %v2578_v61 = vpop.eup %2577 }
 0x5dd   :  { %v810_v62 = vsel %vm313_vm2, %v2578_v61, 0.0 }
 0x5de   :  { %811 = vadd.xlane.f32.xlu1 %v810_v62 }
 0x5ef   :  { %1047 = vrot.lane.b32.xlu1 %v3290_v9, %s2983_s5 }
 0x667   :  { %v809_v1 = vpop.xlane.xlu1 %808 }
 0x668   :  { %2579 = vrcp.f32 %v809_v1 }
 0x66b   :  { %v812_v2 = vpop.xlane.xlu1 %811 }
 0x66c   :  { %2581 = vrcp.f32 %v812_v2 }
 0x66f   :  { %v1048_v11 = vpop.permute.xlu1 %1047 }
 0x672   :  { %v2580_v3 = vpop.eup %2579 }
 0x673   :  { %v814_v4 = vmul.f32 %v2580_v3, %v2576_v59 }
 0x675   :  { %2379 = vmatmul.mubr.msk.f32.vlgmr.msra.gmra.mrb[6].mxu0 %vm313_vm2, %v814_v4 }
 0x676   :  { %v2582_v5 = vpop.eup %2581  ;;  %2387 = vmatpush3.xpose.msk.msra.mxu0 %vm313_vm2, %v972_v63  ;;  %2388 = vmatprep.mubr.msk.f32.mxu0 %vm2976_vm1, %v2975_v8 }
 0x677   :  { %v816_v6 = vmul.f32 %v2582_v5, %v2578_v61  ;;  %2396 = vmatprep.subr.mxu0 %v2975_v8 }
 0x679   :  { %2384 = vmatmul.mubr.msk.f32.vlgmr.msra.gmra.mrb[8].mxu1 %vm313_vm2, %v816_v6  ;;  %2389 = vmatmul.mubr.msk.f32.vlgmr.msra.gmra.mrb[8].mxu0 %vm313_vm2, %v970_v7 }
 0x67a   :  { %2392 = vmatpush3.xpose.msk.msra.mxu1 %vm313_vm2, %v1050_v0  ;;  %2393 = vmatprep.mubr.msk.f32.mxu1 %vm2976_vm1, %v2975_v8 }
 0x67b   :  { %2401 = vmatprep.subr.mxu1 %v2975_v8  ;;  %2398 = vmatprep.mubr.msk.f32.mxu0 %vm2976_vm1, %v2975_v8 }
 0x67d   :  { %2394 = vmatmul.mubr.msk.f32.vlgmr.msra.gmra.mrb[10].mxu1 %vm313_vm2, %v1048_v11 }
 0x67e   :  { %2403 = vmatprep.mubr.msk.f32.mxu1 %vm2976_vm1, %v2975_v8 }
 0x748   :  { %v3368_v12 = vpop.f32.mrb[6].mxu0 }
 0x749   :  { %v2380_v13 = vpop.f32.mrb[7].mxu0 }
 0x74a   :  { %v1662_v13 = vld [vmem:[#allocation7 + $0x8] sm:$0xff] }
 0x74c   :  { %v3370_v14 = vpop.f32.mrb[8].mxu1  ;;  %v1043_v15 = vpop.f32.mrb[8].mxu0 }
 0x74d   :  { %v2385_v16 = vpop.f32.mrb[9].mxu1  ;;  %v2390_v17 = vpop.f32.mrb[9].mxu0  ;;  %v1125_v18 = vsel %vm313_vm2, %v1043_v15, -inf }
 0x74e   :  { %1126 = vmax.xlane.f32.xlu0 %v1125_v18 }
 0x750   :  { %v1121_v19 = vpop.f32.mrb[10].mxu1 }
 0x751   :  { %v2395_v20 = vpop.f32.mrb[11].mxu1  ;;  %v1128_v21 = vsel %vm313_vm2, %v1121_v19, -inf }
 0x752   :  { %1129 = vmax.xlane.f32.xlu1 %v1128_v21 }
 0x763   :  { %1147 = vrot.lane.b32.xlu1 %v3292_v10, %s2984_s11 }
 0x764   :  { %1223 = vrot.lane.b32.xlu0 %v3290_v9, %s2984_s11 }
 0x767   :  { %1301 = vrot.lane.b32.xlu1 %v3292_v10, %s2985_s3 }
 0x76b   :  { %1379 = vrot.lane.b32.xlu1 %v3290_v9, %s2985_s3 }
 0x76f   :  { %1377 = vrot.lane.b32.xlu1 %v3290_v9, %s2986_s20 }
 0x7db   :  { %v1127_v22 = vpop.xlane.xlu0 %1126 }
 0x7dc   :  { %v1131_v23 = vsub.f32 %v1043_v15, %v1127_v22  ;;  %v1664_v15 = vld [vmem:[#allocation7 + $0x18] sm:$0xff] }
 0x7de   :  { %v1133_v24 = vmul.f32 1.442695, %v1131_v23 }
 0x7df   :  { %v1130_v25 = vpop.xlane.xlu1 %1129  ;;  %v1224_v26 = vpop.permute.xlu0 %1223 }
 0x7e0   :  { %2583 = vpow2.f32 %v1133_v24  ;;  %v1132_v27 = vsub.f32 %v1121_v19, %v1130_v25  ;;  %2402 = vmatpush3.msra.mxu1 %v1224_v26 }
 0x7e1   :  { %2411 = vmatprep.subr.mxu1 %v2975_v8 }
 0x7e2   :  { %v1135_v28 = vmul.f32 1.442695, %v1132_v27 }
 0x7e3   :  { %v1148_v29 = vpop.permute.xlu1 %1147 }
 0x7e4   :  { %2585 = vpow2.f32 %v1135_v28  ;;  %2397 = vmatpush3.msra.mxu0 %v1148_v29 }
 0x7e5   :  { %2406 = vmatprep.subr.mxu0 %v2975_v8 }
 0x7e7   :  { %v1302_v36 = vpop.permute.xlu1 %1301 }
 0x7ea   :  { %v2584_v30 = vpop.eup %2583 }
 0x7eb   :  { %v1137_v31 = vsel %vm313_vm2, %v2584_v30, 0.0  ;;  %v1380_v40 = vpop.permute.xlu1 %1379 }
 0x7ec   :  { %1138 = vadd.xlane.f32.xlu0 %v1137_v31 }
 0x7ee   :  { %v2586_v32 = vpop.eup %2585 }
 0x7ef   :  { %v1140_v33 = vsel %vm313_vm2, %v2586_v32, 0.0  ;;  %v1378_v45 = vpop.permute.xlu1 %1377 }
 0x7f0   :  { %1141 = vadd.xlane.f32.xlu0 %v1140_v33 }
 0x806   :  { %1299 = vrot.lane.b32.xlu0 %v3292_v10, %s2986_s20 }
 0x879   :  { %v1139_v34 = vpop.xlane.xlu0 %1138 }
 0x87a   :  { %2587 = vrcp.f32 %v1139_v34 }
 0x87d   :  { %v1142_v35 = vpop.xlane.xlu0 %1141 }
 0x87e   :  { %2589 = vrcp.f32 %v1142_v35 }
 0x881   :  { %v1300_v44 = vpop.permute.xlu0 %1299 }
 0x884   :  { %v2588_v37 = vpop.eup %2587 }
 0x885   :  { %v1144_v38 = vmul.f32 %v2588_v37, %v2584_v30 }
 0x887   :  { %2399 = vmatmul.mubr.msk.f32.vlgmr.msra.gmra.mrb[10].mxu0 %vm313_vm2, %v1144_v38 }
 0x888   :  { %v2590_v39 = vpop.eup %2589  ;;  %2407 = vmatpush3.xpose.msk.msra.mxu0 %vm313_vm2, %v1302_v36  ;;  %2408 = vmatprep.mubr.msk.f32.mxu0 %vm2976_vm1, %v2975_v8 }
 0x889   :  { %v1146_v42 = vmul.f32 %v2590_v39, %v2586_v32  ;;  %2416 = vmatprep.subr.mxu0 %v2975_v8 }
 0x88b   :  { %2404 = vmatmul.mubr.msk.f32.vlgmr.msra.gmra.mrb[12].mxu1 %vm313_vm2, %v1146_v42  ;;  %2409 = vmatmul.mubr.msk.f32.vlgmr.msra.gmra.mrb[12].mxu0 %vm313_vm2, %v1300_v44 }
 0x88c   :  { %2412 = vmatpush3.xpose.msk.msra.mxu1 %vm313_vm2, %v1380_v40  ;;  %2413 = vmatprep.mubr.msk.f32.mxu1 %vm2976_vm1, %v2975_v8 }
 0x88d   :  { %2421 = vmatprep.subr.mxu1 %v2975_v8  ;;  %2418 = vmatprep.mubr.msk.f32.mxu0 %vm2976_vm1, %v2975_v8 }
 0x88f   :  { %2414 = vmatmul.mubr.msk.f32.vlgmr.msra.gmra.mrb[14].mxu1 %vm313_vm2, %v1378_v45 }
 0x890   :  { %2423 = vmatprep.mubr.msk.f32.mxu1 %vm2976_vm1, %v2975_v8 }
 0x95a   :  { %v1219_v46 = vpop.f32.mrb[10].mxu0 }
 0x95b   :  { %v2400_v47 = vpop.f32.mrb[11].mxu0 }
 0x95e   :  { %v1295_v48 = vpop.f32.mrb[12].mxu1  ;;  %v1373_v49 = vpop.f32.mrb[12].mxu0 }
 0x95f   :  { %v2405_v50 = vpop.f32.mrb[13].mxu1  ;;  %v2410_v51 = vpop.f32.mrb[13].mxu0  ;;  %v1455_v52 = vsel %vm313_vm2, %v1373_v49, -inf }
 0x960   :  { %1456 = vmax.xlane.f32.xlu0 %v1455_v52  ;;  %v1792_v50 = vld [vmem:[#allocation11 + $0x8] sm:$0xff]  ;;  %v1793_v52 = vld [vmem:[#allocation11 + $0x10] sm:$0xff] }
 0x962   :  { %v1451_v53 = vpop.f32.mrb[14].mxu1 }
 0x963   :  { %v2415_v54 = vpop.f32.mrb[15].mxu1  ;;  %v1458_v55 = vsel %vm313_vm2, %v1451_v53, -inf }
 0x964   :  { %1459 = vmax.xlane.f32.xlu1 %v1458_v55 }
 0x975   :  { %1477 = vrot.lane.b32.xlu1 %v3292_v10, %s2987_s22 }
 0x979   :  { %1631 = vrot.lane.b32.xlu1 %v3368_v12, %s2962_s26  ;;  %v1661_v12 = vld [vmem:[#allocation7] sm:$0xff] }
 0x97d   :  { %1633 = vrot.lane.b32.xlu1 %v3370_v14, %s2962_s26  ;;  %v2493_v14 = vpack.c.bf16 %v1662_v13, %v1661_v12  ;;  %s2989_s26 = smov 24   ;;  %v1903_v12 = vld [vmem:[#allocation14 + $0x10] sm:$0xff]  ;;  %v1904_v13 = vld [vmem:[#allocation14 + $0x18] sm:$0xff] }
 0x981   :  { %1641 = vrot.lane.b32.xlu1 %v1295_v48, %s2988_s2 }
 0x9ed   :  { %v1457_v56 = vpop.xlane.xlu0 %1456 }
 0x9ee   :  { %v1461_v57 = vsub.f32 %v1373_v49, %v1457_v56  ;;  %v1791_v49 = vld [vmem:[#allocation11] sm:$0xff] }
 0x9ef   :  { %v2501_v51 = vpack.c.bf16 %v1792_v50, %v1791_v49 }
 0x9f0   :  { %v1463_v58 = vmul.f32 1.442695, %v1461_v57 }
 0x9f1   :  { %v1460_v59 = vpop.xlane.xlu1 %1459 }
 0x9f2   :  { %2591 = vpow2.f32 %v1463_v58  ;;  %v1462_v60 = vsub.f32 %v1451_v53, %v1460_v59  ;;  %v1794_v53 = vld [vmem:[#allocation11 + $0x18] sm:$0xff] }
 0x9f3   :  { %v2505_v54 = vpack.c.bf16 %v1794_v53, %v1793_v52 }
 0x9f4   :  { %v1465_v61 = vmul.f32 1.442695, %v1462_v60 }
 0x9f5   :  { %v1478_v62 = vpop.permute.xlu1 %1477 }
 0x9f6   :  { %2593 = vpow2.f32 %v1465_v61  ;;  %2417 = vmatpush3.msra.mxu0 %v1478_v62  ;;  %v2254_v62 = vld [vmem:[#allocation8] ss:$0 sm:$0xff] }
 0x9f7   :  { %2494 = vmatprep.subr.bf16.mxu0 %v2493_v14 }
 0x9f9   :  { %v1632_v21 = vpop.permute.xlu1 %1631 }
 0x9fa   :  { %v1653_v24 = vsel %vm313_vm2, %v3336_v41, %v1632_v21 }
 0x9fc   :  { %v2592_v63 = vpop.eup %2591 }
 0x9fd   :  { %v1467_v10 = vsel %vm313_vm2, %v2592_v63, 0.0  ;;  %v1634_v22 = vpop.permute.xlu1 %1633 }
 0x9fe   :  { %1468 = vadd.xlane.f32.xlu0 %v1467_v10  ;;  %v1654_v29 = vsel %vm313_vm2, %v3338_v43, %v1634_v22  ;;  %v2255_v10 = vld [vmem:[#allocation10] ss:$0 sm:$0xff] }
 0xa00   :  { %v2594_v0 = vpop.eup %2593 }
 0xa01   :  { %v1470_v1 = vsel %vm313_vm2, %v2594_v0, 0.0  ;;  %v1642_v25 = vpop.permute.xlu1 %1641 }
 0xa02   :  { %1471 = vadd.xlane.f32.xlu0 %v1470_v1  ;;  %v1657_v30 = vsel %vm1655_vm4, %v1654_v29, %v1642_v25 }
 0xa18   :  { %1553 = vrot.lane.b32.xlu0 %v3290_v9, %s2987_s22  ;;  %v1663_v9 = vld [vmem:[#allocation7 + $0x10] sm:$0xff] }
 0xa19   :  { %v2497_v16 = vpack.c.bf16 %v1664_v15, %v1663_v9  ;;  %v1905_v9 = vld [vmem:[#allocation14 + $0x20] sm:$0xff]  ;;  %v1906_v15 = vld [vmem:[#allocation14 + $0x28] sm:$0xff] }
 0xa1c   :  { %1639 = vrot.lane.b32.xlu0 %v1219_v46, %s2988_s2 }
 0xa8b   :  { %v1469_v2 = vpop.xlane.xlu0 %1468 }
 0xa8c   :  { %2595 = vrcp.f32 %v1469_v2 }
 0xa8f   :  { %v1472_v3 = vpop.xlane.xlu0 %1471 }
 0xa90   :  { %2597 = vrcp.f32 %v1472_v3 }
 0xa93   :  { %v1554_v4 = vpop.permute.xlu0 %1553 }
 0xa94   :  { %2422 = vmatpush3.msra.mxu1 %v1554_v4 }
 0xa95   :  { %2502 = vmatprep.subr.bf16.mxu1 %v2501_v51 }
 0xa96   :  { %v2596_v5 = vpop.eup %2595 }
 0xa97   :  { %v1474_v6 = vmul.f32 %v2596_v5, %v2592_v63  ;;  %v1640_v23 = vpop.permute.xlu0 %1639 }
 0xa98   :  { %v1656_v26 = vsel %vm1655_vm4, %v1653_v24, %v1640_v23 }
 0xa99   :  { %2419 = vmatmul.mubr.msk.f32.vlgmr.msra.gmra.mrb[14].mxu0 %vm313_vm2, %v1474_v6  ;;  %v1901_v6 = vld [vmem:[#allocation14] sm:$0xff] }
 0xa9a   :  { %v2598_v7 = vpop.eup %2597  ;;  %2496 = vmatpush3.bf16.msra.mxu0 %v2493_v14  ;;  %v2513_v14 = vpack.c.bf16 %v1904_v13, %v1903_v12  ;;  %v2263_v12 = vld [vmem:[#allocation19] ss:$0 sm:$0xff] }
 0xa9b   :  { %v1476_v11 = vmul.f32 %v2598_v7, %v2594_v0  ;;  %2498 = vmatprep.subr.bf16.mxu0 %v2497_v16  ;;  %v1902_v7 = vld [vmem:[#allocation14 + $0x8] sm:$0xff] }
 0xa9d   :  { %2424 = vmatmul.mubr.msk.f32.vlgmr.msra.gmra.mrb[16].mxu1 %vm313_vm2, %v1476_v11  ;;  %v2509_v11 = vpack.c.bf16 %v1902_v7, %v1901_v6 }
 0xa9e   :  { %2500 = vmatpush3.bf16.msra.mxu0 %v2497_v16  ;;  %2504 = vmatpush3.bf16.msra.mxu1 %v2501_v51  ;;  %v2517_v16 = vpack.c.bf16 %v1906_v15, %v1905_v9 }
 0xa9f   :  { %2506 = vmatprep.subr.bf16.mxu1 %v2505_v54  ;;  %2510 = vmatprep.subr.bf16.mxu0 %v2509_v11 }
 0xaa2   :  { %2508 = vmatpush3.bf16.msra.mxu1 %v2505_v54 }
 0xb6c   :  { %v1549_v17 = vpop.f32.mrb[14].mxu0 }
 0xb6d   :  { %1647 = vrot.lane.b32.xlu0 %v1549_v17, %s2989_s26  ;;  %v2420_v18 = vpop.f32.mrb[15].mxu0  ;;  %v1907_v17 = vld [vmem:[#allocation14 + $0x30] sm:$0xff] }
 0xb6e   :  { %v1908_v18 = vld [vmem:[#allocation14 + $0x38] sm:$0xff] }
 0xb70   :  { %v1625_v19 = vpop.f32.mrb[16].mxu1 }
 0xb71   :  { %1649 = vrot.lane.b32.xlu1 %v1625_v19, %s2989_s26  ;;  %v2425_v20 = vpop.f32.mrb[17].mxu1  ;;  %v2521_v19 = vpack.c.bf16 %v1908_v18, %v1907_v17  ;;  %v2119_v17 = vld [vmem:[#allocation20 + $0x8] sm:$0xff] }
 0xb72   :  { %v2256_v20 = vld [vmem:[#allocation13] ss:$0 sm:$0xff] }
 0xbdf   :  { %v1648_v27 = vpop.permute.xlu0 %1647 }
 0xbe0   :  { %v1659_v28 = vsel %vm1658_vm3, %v1656_v26, %v1648_v27 }
 0xbe1   :  { %2434 = vmatprep.mubr.msk.f32.mxu0 %vm228_vm0, %v1659_v28 }
 0xbe3   :  { %v1650_v31 = vpop.permute.xlu1 %1649 }
 0xbe4   :  { %v1660_v32 = vsel %vm1658_vm3, %v1657_v30, %v1650_v31 }
 0xbe5   :  { %2435 = vmatmul.mubr.msk.f32.vlgmr.msra.gmra.mrb[16].mxu0 %vm228_vm0, %v1660_v32 }
 0xbe6   :  { %2512 = vmatpush3.bf16.msra.mxu0 %v2509_v11 }
 0xbe7   :  { %2514 = vmatprep.subr.bf16.mxu0 %v2513_v14 }
 0xbea   :  { %2516 = vmatpush3.bf16.msra.mxu0 %v2513_v14 }
 0xbeb   :  { %2518 = vmatprep.subr.bf16.mxu0 %v2517_v16 }
 0xbee   :  { %2520 = vmatpush3.bf16.msra.mxu0 %v2517_v16  ;;  %v2118_v16 = vld [vmem:[#allocation20] sm:$0xff] }
 0xbef   :  { %2522 = vmatprep.subr.bf16.mxu0 %v2521_v19 }
 0xbf2   :  { %2524 = vmatpush3.bf16.msra.mxu0 %v2521_v19  ;;  %v2044_v19 = vld [vmem:[#allocation23] sm:$0x3] }
 0xcb8   :  { %v2436_v33 = vpop.f32.mrb[16].mxu0 }
 0xcb9   :  { %v1743_v34 = vadd.f32 %v2436_v33, %v1660_v32  ;;  %v1737_v41 = vpop.f32.mrb[17].mxu0 }
 0xcba   :  { %v1738_v35 = vadd.f32 %v1737_v41, %v1659_v28 }
 0xcbb   :  { %v1751_v36 = vsel %vm228_vm0, %v1743_v34, 0.0 }
 0xcbc   :  { %1752 = vadd.xlane.f32.xlu1 %v1751_v36  ;;  %v1748_v37 = vsel %vm228_vm0, %v1738_v35, 0.0 }
 0xcbd   :  { %1749 = vadd.xlane.f32.xlu0 %v1748_v37 }
 0xd49   :  { %v1753_v38 = vpop.xlane.xlu1 %1752 }
 0xd4a   :  { %v1756_v39 = vmul.f32 0.03125, %v1753_v38  ;;  %v1750_v40 = vpop.xlane.xlu0 %1749 }
 0xd4b   :  { %v1755_v43 = vmul.f32 0.03125, %v1750_v40 }
 0xd4c   :  { %v1758_v42 = vsub.f32 %v1743_v34, %v1756_v39 }
 0xd4d   :  { %v1757_v44 = vsub.f32 %v1738_v35, %v1755_v43 }
 0xd4e   :  { %v1760_v47 = vmul.f32 %v1758_v42, %v1758_v42 }
 0xd4f   :  { %v1759_v45 = vmul.f32 %v1757_v44, %v1757_v44 }
 0xd50   :  { %v1764_v48 = vsel %vm228_vm0, %v1760_v47, 0.0 }
 0xd51   :  { %v1761_v46 = vsel %vm228_vm0, %v1759_v45, 0.0 }
 0xd52   :  { %1762 = vadd.xlane.f32.xlu0 %v1761_v46 }
 0xd56   :  { %1765 = vadd.xlane.f32.xlu0 %v1764_v48 }
 0xddf   :  { %v1763_v55 = vpop.xlane.xlu0 %1762 }
 0xde0   :  { %v1767_v56 = vmul.f32 0.03125, %v1763_v55 }
 0xde2   :  { %v1769_v57 = vadd.f32 1e-05, %v1767_v56 }
 0xde3   :  { %v1766_v58 = vpop.xlane.xlu0 %1765 }
 0xde4   :  { %2599 = vrsqrt.f32 %v1769_v57  ;;  %v1768_v59 = vmul.f32 0.03125, %v1766_v58 }
 0xde6   :  { %v1770_v60 = vadd.f32 1e-05, %v1768_v59 }
 0xde8   :  { %2601 = vrsqrt.f32 %v1770_v60 }
 0xdee   :  { %v2600_v61 = vpop.eup %2599 }
 0xdef   :  { %v1773_v63 = vmul.f32 %v2600_v61, %v1757_v44 }
 0xdf1   :  { %v1781_v0 = vmul.f32 %v2254_v62, %v1773_v63 }
 0xdf2   :  { %v2602_v1 = vpop.eup %2601 }
 0xdf3   :  { %v1774_v2 = vmul.f32 %v2602_v1, %v1758_v42  ;;  %v1789_v3 = vadd.f32 %v2255_v10, %v1781_v0  ;;  %v2259_v42 = vld [vmem:[#allocation16] ss:$0 sm:$0xff] }
 0xdf5   :  { %v1782_v4 = vmul.f32 %v2254_v62, %v1774_v2  ;;  %2445 = vmatprep.mubr.msk.f32.mxu1 %vm228_vm0, %v1789_v3  ;;  %v2990_v62 = vmov 0.0|0.0  }
 0xdf6   :  { %2525 = vmatprep.subr.bf16.mxu1 %v2990_v62 }
 0xdf7   :  { %v1790_v5 = vadd.f32 %v2255_v10, %v1782_v4 }
 0xdf9   :  { %2446 = vmatmul.mubr.msk.f32.vlgmr.msra.gmra.mrb[18].mxu1 %vm228_vm0, %v1790_v5 }
 0xdfa   :  { %2471 = vmatprep.mubr.msk.f32.mxu1 %vm2976_vm1, %v2975_v8 }
 0xecc   :  { %v2447_v21 = vpop.f32.mrb[18].mxu1 }
 0xecd   :  { %v1880_v22 = vadd.f32 %v2447_v21, %v2256_v20  ;;  %v1874_v23 = vpop.f32.mrb[19].mxu1  ;;  %v2120_v21 = vld [vmem:[#allocation20 + $0x10] sm:$0xff] }
 0xece   :  { %v1875_v24 = vadd.f32 %v2256_v20, %v1874_v23  ;;  %v2529_v20 = vpack.c.bf16 %v2119_v17, %v2118_v16 }
 0xecf   :  { %v1886_v25 = vmul.f32 0.044715, %v1880_v22  ;;  %v1884_v39 = vmul.f32 0.5, %v1880_v22 }
 0xed0   :  { %v1885_v26 = vmul.f32 0.044715, %v1875_v24  ;;  %v1883_v37 = vmul.f32 0.5, %v1875_v24 }
 0xed1   :  { %v1888_v27 = vmul.f32 %v1886_v25, %v1880_v22 }
 0xed2   :  { %v1887_v28 = vmul.f32 %v1885_v26, %v1875_v24  ;;  %v2265_v26 = vld [vmem:[#allocation22] ss:$0 sm:$0xff] }
 0xed3   :  { %v1890_v29 = vmul.f32 %v1888_v27, %v1880_v22 }
 0xed4   :  { %v1889_v30 = vmul.f32 %v1887_v28, %v1875_v24 }
 0xed5   :  { %v1892_v31 = vadd.f32 %v1890_v29, %v1880_v22  ;;  %v2121_v22 = vld [vmem:[#allocation20 + $0x18] sm:$0xff] }
 0xed6   :  { %v1891_v32 = vadd.f32 %v1889_v30, %v1875_v24  ;;  %v2532_v23 = vpack.c.bf16 %v2121_v22, %v2120_v21 }
 0xed7   :  { %v1894_v33 = vmul.f32 0.7978846, %v1892_v31 }
 0xed8   :  { %v1893_v34 = vmul.f32 0.7978846, %v1891_v32 }
 0xed9   :  { %2603 = vtanh.f32 %v1894_v33 }
 0xeda   :  { %2605 = vtanh.f32 %v1893_v34 }
 0xee3   :  { %v2604_v41 = vpop.eup %2603 }
 0xee4   :  { %v2606_v35 = vpop.eup %2605  ;;  %v1898_v36 = vadd.f32 1.0, %v2604_v41 }
 0xee5   :  { %v1897_v38 = vadd.f32 1.0, %v2606_v35 }
 0xee6   :  { %v1900_v43 = vmul.f32 %v1898_v36, %v1884_v39 }
 0xee7   :  { %v1899_v40 = vmul.f32 %v1897_v38, %v1883_v37 }
 0xee9   :  { %2464 = vmatprep.mubr.msk.f32.mxu0 %vm1916_vm5, %v1899_v40 }
 0xeea   :  { %2465 = vmatmul.mubr.msk.f32.vlgmr.msra.gmra.mrb[18].mxu0 %vm1916_vm5, %v1900_v43 }
 0xfbd   :  { %v2466_v44 = vpop.f32.mrb[18].mxu0 }
 0xfbe   :  { %v1995_v45 = vadd.f32 %v2466_v44, %v2259_v42  ;;  %v1989_v46 = vpop.f32.mrb[19].mxu0 }
 0xfbf   :  { %v1990_v47 = vadd.f32 %v2259_v42, %v1989_v46 }
 0xfc0   :  { %v1999_v48 = vadd.f32 %v1995_v45, %v1790_v5  ;;  %v2262_v5 = vld [vmem:[#allocation17] ss:$0 sm:$0xff] }
 0xfc1   :  { %v1998_v49 = vadd.f32 %v1990_v47, %v1789_v3 }
 0xfc2   :  { %v2005_v50 = vsel %vm228_vm0, %v1999_v48, 0.0 }
 0xfc3   :  { %2006 = vadd.xlane.f32.xlu0 %v2005_v50  ;;  %v2002_v51 = vsel %vm228_vm0, %v1998_v49, 0.0 }
 0xfc4   :  { %2003 = vadd.xlane.f32.xlu1 %v2002_v51 }
0x1050   :  { %v2007_v52 = vpop.xlane.xlu0 %2006 }
0x1051   :  { %v2009_v53 = vmul.f32 0.03125, %v2007_v52  ;;  %v2004_v54 = vpop.xlane.xlu1 %2003 }
0x1052   :  { %v2008_v55 = vmul.f32 0.03125, %v2004_v54 }
0x1053   :  { %v2011_v56 = vsub.f32 %v1999_v48, %v2009_v53 }
0x1054   :  { %v2010_v57 = vsub.f32 %v1998_v49, %v2008_v55 }
0x1055   :  { %v2013_v58 = vmul.f32 %v2011_v56, %v2011_v56 }
0x1056   :  { %v2012_v59 = vmul.f32 %v2010_v57, %v2010_v57 }
0x1057   :  { %v2017_v60 = vsel %vm228_vm0, %v2013_v58, 0.0 }
0x1058   :  { %2018 = vadd.xlane.f32.xlu0 %v2017_v60  ;;  %v2014_v61 = vsel %vm228_vm0, %v2012_v59, 0.0 }
0x1059   :  { %2015 = vadd.xlane.f32.xlu1 %v2014_v61 }
0x10e5   :  { %v2019_v63 = vpop.xlane.xlu0 %2018 }
0x10e6   :  { %v2021_v10 = vmul.f32 0.03125, %v2019_v63  ;;  %v2016_v0 = vpop.xlane.xlu1 %2015 }
0x10e7   :  { %v2020_v1 = vmul.f32 0.03125, %v2016_v0 }
0x10e8   :  { %v2023_v2 = vadd.f32 1e-05, %v2021_v10 }
0x10e9   :  { %v2022_v3 = vadd.f32 1e-05, %v2020_v1 }
0x10ea   :  { %2607 = vrsqrt.f32 %v2023_v2 }
0x10eb   :  { %2609 = vrsqrt.f32 %v2022_v3 }
0x10f4   :  { %v2608_v4 = vpop.eup %2607 }
0x10f5   :  { %v2610_v6 = vpop.eup %2609  ;;  %v2027_v7 = vmul.f32 %v2608_v4, %v2011_v56 }
0x10f6   :  { %v2026_v11 = vmul.f32 %v2610_v6, %v2010_v57 }
0x10f7   :  { %v2035_v13 = vmul.f32 %v2262_v5, %v2027_v7 }
0x10f8   :  { %v2034_v14 = vmul.f32 %v2262_v5, %v2026_v11 }
0x10f9   :  { %v2043_v9 = vadd.f32 %v2263_v12, %v2035_v13 }
0x10fa   :  { %v2042_v15 = vadd.f32 %v2263_v12, %v2034_v14 }
0x10fc   :  { %v2526_v18 = vpack.c.bf16 %v2043_v9, %v2042_v15 }
0x10fe   :  { %2527 = vmatpush3.bf16.msra.mxu1 %v2526_v18 }
0x10ff   :  { %2528 = vmatprep.subr.bf16.mxu1 %v2990_v62 }
0x1101   :  { %2472 = vmatmul.mubr.msk.f32.vlgmr.msra.gmra.mrb[20].mxu1 %vm1655_vm4, %v2044_v19 }
0x1102   :  { %2530 = vmatpush3.bf16.msra.mxu1 %v2529_v20  ;;  %2482 = vmatprep.mubr.msk.f32.mxu1 %vm2976_vm1, %v2975_v8 }
0x1103   :  { %2531 = vmatprep.subr.bf16.mxu1 %v2990_v62 }
0x1106   :  { %2533 = vmatpush3.bf16.msra.mxu1 %v2532_v23 }
0x11d4   :  { %v2114_v24 = vpop.f32.mrb[20].mxu1 }
0x11d5   :  { %v2473_v25 = vpop.f32.mrb[21].mxu1  ;;  %2483 = vmatmul.mubr.msk.f32.vlgmr.msra.gmra.mrb[22].mxu1 %vm228_vm0, %v2114_v24 }
0x12a8   :  { %v2198_v27 = vpop.f32.mrb[22].mxu1 }
0x12a9   :  { %v2199_v28 = vadd.f32 %v2265_v26, %v2198_v27  ;;  %v2484_v29 = vpop.f32.mrb[23].mxu1 }
0x12ab   :  { %2203 = vst.msk [vmem:[#allocation25] sm:$0x3] %vm2202_vm6, %v2199_v28 }
0x12ac   :  { %2930 = shalt.err (!%p2927_p4)
}
0x12ad   :  { %s2931_s18 = scalar_lea.hbm %s3462_s14, 32 }
0x12ae   :  { %p2932_p5 = scmp.ne.s32.totalorder %s3462_s14, %s2931_s18  ;;  %p2935_p6 = scmp.lt.u32.totalorder %s2931_s18, %s3462_s14 }
0x12b0   :  { %p2937_p7 = pnand %p2935_p6, %p2932_p5 }
0x12b2   :  { %2940 = shalt.err (!%p2937_p7)
}
0x12b3   :  { %2213 = dma.vmem_to_hbm [thread:$0]  %s2211_s15, 32, %s3462_s14, [#allocation4]  }
0x12b4   :  { %2957 = dma.done.wait [#allocation4], 32  }
0x12b5   :  { %2958 = vsyncadd [#allocation4], 4294967264 }
0x12b6   :  { %2217 = vsyncpa [#allocation3], 1 }
0x12b7   :  { %2218 = vsyncpa [#allocation6], 1 }
0x12b8   :  { %2219 = vsyncpa [#allocation9], 1 }
0x12b9   :  { %2220 = vsyncpa [#allocation12], 1 }
0x12ba   :  { %2221 = vsyncpa [#allocation15], 1 }
0x12bb   :  { %2222 = vsyncpa [#allocation18], 1 }
0x12bc   :  { %2223 = vsyncpa [#allocation21], 1 }
0x12bd   :  { %2224 = vsyncpa [#allocation24], 1 }
0x12be   :  { %2225 = vsyncpa [#allocation4], 1 }

</bundles_post_ra>
